<compile_context>
chip_gen: v6e
topology: v6e:2x2x1
jax: 0.10.0
libtpu: 0.0.40
codegen_flags: <defaults>
</compile_context>

<pallas_src>
import jax
import jax.numpy as jnp
import numpy as np
from jax.experimental import pallas as pl
from jax.experimental.pallas import tpu as pltpu

BN_EPS = 1e-5


# ---------------------------------------------------------------------------
# helpers
# ---------------------------------------------------------------------------
def _pick_row_tile(P, target, min_blocks=2):
    """Largest divisor of P that is <= target, a multiple of 8, and (if possible)
    leaves at least `min_blocks` grid blocks for megacore parallelism."""
    cands = [t for t in range(1, min(P, target) + 1) if P % t == 0 and t % 8 == 0]
    if not cands:
        return P
    good = [t for t in cands if P // t >= min_blocks]
    return max(good) if good else max(cands)


def _pick_batch_block(N, rows_per_image, target_rows=512, min_blocks=2):
    """Largest divisor nb of N with nb*rows_per_image <= target_rows, keeping at
    least `min_blocks` batch blocks when N allows (so both TCs work on v7x)."""
    best = 1
    for nb in range(1, N + 1):
        if N % nb != 0 or nb * rows_per_image > target_rows:
            continue
        if N >= min_blocks and N // nb < min_blocks:
            continue
        best = nb
    return best


def _fold_bn_stats(stats, count, gamma, beta):
    """stats: (G, 8, C); row 0 = partial sums, row 1 = partial sums of squares.
    Note: E[x^2]-E[x]^2 in f32 is cancellation-prone for |mean|>>std; fine at
    this scale/tolerance (training-mode BN over the batch)."""
    s = jnp.sum(stats[:, 0, :], axis=0)
    ss = jnp.sum(stats[:, 1, :], axis=0)
    mean = s / count
    var = ss / count - mean * mean              # biased variance (PyTorch train BN)
    inv = jax.lax.rsqrt(var + BN_EPS)
    scale = gamma * inv
    shift = beta - mean * scale
    return scale, shift


def _stats_block(acc, C):
    """Pack per-channel sum / sumsq into an 8-sublane block (rows 0/1 used)."""
    s = jnp.sum(acc, axis=0, keepdims=True)
    ss = jnp.sum(acc * acc, axis=0, keepdims=True)
    rows = jax.lax.broadcasted_iota(jnp.int32, (8, C), 0)
    return jnp.where(rows == 0, s, jnp.where(rows == 1, ss, 0.0))


# ---------------------------------------------------------------------------
# Kernel 1: conv1 (2x2 / stride 2 == space-to-depth GEMM) + partial BN stats
# ---------------------------------------------------------------------------
def _conv1_matmul_stats_kernel(p_ref, w_ref, y_ref, st_ref):
    # p: (tm, K) bf16, w: (K, C1) bf16, y: (tm, C1) bf16, st: (1, 8, C1) f32
    y = jnp.dot(p_ref[...], w_ref[...], preferred_element_type=jnp.float32)
    y_ref[...] = y.astype(y_ref.dtype)
    st_ref[...] = _stats_block(y, y.shape[1]).reshape(st_ref.shape)


def conv1_matmul_stats(patches, w_mat, *, target_rows=512):
    P, K = patches.shape
    C = w_mat.shape[1]
    tm = _pick_row_tile(P, target_rows)
    G = P // tm
    return pl.pallas_call(
        _conv1_matmul_stats_kernel,
        out_shape=(
            jax.ShapeDtypeStruct((P, C), jnp.bfloat16),     # y1 stored bf16
            jax.ShapeDtypeStruct((G, 8, C), jnp.float32),   # partial BN stats
        ),
        grid=(G,),
        in_specs=[
            pl.BlockSpec((tm, K), lambda i: (i, 0)),
            pl.BlockSpec((K, C), lambda i: (0, 0)),         # weight VMEM-resident
        ],
        out_specs=(
            pl.BlockSpec((tm, C), lambda i: (i, 0)),
            pl.BlockSpec((1, 8, C), lambda i: (i, 0, 0)),
        ),
        compiler_params=pltpu.CompilerParams(dimension_semantics=("parallel",)),
    )(patches, w_mat)


# ---------------------------------------------------------------------------
# Kernel 2: fused (BN1 scale/shift + ReLU + pad=1) -> 3x3/s1 conv -> partial BN2
#           stats.  Weights fully VMEM-resident, all 9 taps unrolled in-kernel.
# ---------------------------------------------------------------------------
def _conv2_fused_kernel(y1_ref, sc1_ref, sh1_ref, w2_ref, y2_ref, st_ref, a1p_ref):
    # y1: (nb, Ho, Wo, C1) bf16   sc1/sh1: (1, C1) f32
    # w2: (3, 3, C1, C2) bf16 (constant block -> resident)
    # y2: (nb, Ho, Wo, C2) bf16   st: (1, 8, C2) f32
    # a1p scratch: (nb, Ho+2, Wo+2, C1) bf16  (zero-padded, normalized activation)
    nb, Ho, Wo, C1 = y1_ref.shape
    C2 = w2_ref.shape[-1]
    M = nb * Ho * Wo

    # Layer-1 pass-2 (BN scale/shift + ReLU) fused; pad=1 handled by writing the
    # interior of a zeroed VMEM scratch -- no HBM round-trip for a1 or its pad.
    a1p_ref[...] = jnp.zeros_like(a1p_ref)
    a1 = jnp.maximum(
        y1_ref[...].astype(jnp.float32) * sc1_ref[...] + sh1_ref[...], 0.0)
    a1p_ref[:, 1:Ho + 1, 1:Wo + 1, :] = a1.astype(a1p_ref.dtype)

    # 3x3 conv: 9 taps unrolled, f32 accumulation, bf16 MXU operands.
    acc = jnp.zeros((M, C2), jnp.float32)
    for di in range(3):
        for dj in range(3):
            slab = a1p_ref[:, di:di + Ho, dj:dj + Wo, :].reshape(M, C1)
            acc = acc + jnp.dot(slab, w2_ref[di, dj],
                                preferred_element_type=jnp.float32)

    y2_ref[...] = acc.reshape(y2_ref.shape).astype(y2_ref.dtype)
    st_ref[...] = _stats_block(acc, C2).reshape(st_ref.shape)


def conv2_fused(y1, sc1, sh1, w2_t, nb):
    # y1: (N, Ho, Wo, C1) bf16; w2_t: (3, 3, C1, C2) bf16
    N, Ho, Wo, C1 = y1.shape
    C2 = w2_t.shape[-1]
    Gn = N // nb
    return pl.pallas_call(
        _conv2_fused_kernel,
        out_shape=(
            jax.ShapeDtypeStruct((N, Ho, Wo, C2), jnp.bfloat16),
            jax.ShapeDtypeStruct((Gn, 8, C2), jnp.float32),
        ),
        grid=(Gn,),
        in_specs=[
            pl.BlockSpec((nb, Ho, Wo, C1), lambda n: (n, 0, 0, 0)),
            pl.BlockSpec((1, C1), lambda n: (0, 0)),
            pl.BlockSpec((1, C1), lambda n: (0, 0)),
            # Whole 3x3xC1xC2 weight as one constant block -> fetched once, resident.
            pl.BlockSpec((3, 3, C1, C2), lambda n: (0, 0, 0, 0)),
        ],
        out_specs=(
            pl.BlockSpec((nb, Ho, Wo, C2), lambda n: (n, 0, 0, 0)),
            pl.BlockSpec((1, 8, C2), lambda n: (n, 0, 0)),
        ),
        scratch_shapes=[pltpu.VMEM((nb, Ho + 2, Wo + 2, C1), jnp.bfloat16)],
        compiler_params=pltpu.CompilerParams(dimension_semantics=("parallel",)),
    )(y1, sc1.reshape(1, C1).astype(jnp.float32),
      sh1.reshape(1, C1).astype(jnp.float32), w2_t)


# ---------------------------------------------------------------------------
# Kernel 3: pass-2 BatchNorm (folded scale/shift) + ReLU, row-tiled, lane-dense
# ---------------------------------------------------------------------------
def _scale_shift_relu_kernel(y_ref, sc_ref, sh_ref, o_ref):
    o_ref[...] = jnp.maximum(
        y_ref[...].astype(jnp.float32) * sc_ref[...] + sh_ref[...],
        0.0).astype(o_ref.dtype)


def scale_shift_relu(y, scale, shift, out_dtype, *, target_rows=1024):
    P, C = y.shape
    t = _pick_row_tile(P, target_rows)
    return pl.pallas_call(
        _scale_shift_relu_kernel,
        out_shape=jax.ShapeDtypeStruct((P, C), out_dtype),
        grid=(P // t,),
        in_specs=[
            pl.BlockSpec((t, C), lambda i: (i, 0)),
            pl.BlockSpec((1, C), lambda i: (0, 0)),
            pl.BlockSpec((1, C), lambda i: (0, 0)),
        ],
        out_specs=pl.BlockSpec((t, C), lambda i: (i, 0)),
        compiler_params=pltpu.CompilerParams(dimension_semantics=("parallel",)),
    )(y, scale.reshape(1, C).astype(jnp.float32),
      shift.reshape(1, C).astype(jnp.float32))


# ---------------------------------------------------------------------------
# Forward pass (plain-JAX glue: layout transforms + BN-stat folding only)
# ---------------------------------------------------------------------------
def vgg16_layer2_forward(x_nchw, p):
    x = jnp.transpose(x_nchw, (0, 2, 3, 1))            # NCHW -> NHWC
    N, H, W, Cin = x.shape
    Ho, Wo = H // 2, W // 2
    P = N * Ho * Wo

    # conv1: 2x2 / stride 2 == space-to-depth (zero duplication) + GEMM.
    # (Space-to-depth kept in XLA glue: a pure reshape/transpose, no 4x blow-up.)
    x = x[:, :Ho * 2, :Wo * 2, :]
    patches = x.reshape(N, Ho, 2, Wo, 2, Cin).transpose(0, 1, 3, 2, 4, 5)
    patches = patches.reshape(P, 4 * Cin).astype(jnp.bfloat16)
    w1 = jnp.transpose(p["w1"], (2, 3, 1, 0)).reshape(4 * Cin, -1).astype(jnp.bfloat16)
    C1 = w1.shape[1]
    # conv bias omitted: exactly cancelled by training-mode BatchNorm mean subtraction
    y1, st1 = conv1_matmul_stats(patches, w1)
    sc1, sh1 = _fold_bn_stats(st1, P, p["g1"], p["be1"])

    # conv2: fused BN1+ReLU+pad + 3x3 conv + partial BN2 stats (single HBM pass).
    w2 = jnp.transpose(p["w2"], (2, 3, 1, 0)).astype(jnp.bfloat16)   # (kh,kw,Cin,Cout)
    C2 = w2.shape[-1]
    nb = _pick_batch_block(N, Ho * Wo)
    y2, st2 = conv2_fused(y1.reshape(N, Ho, Wo, C1), sc1, sh1, w2, nb)
    sc2, sh2 = _fold_bn_stats(st2, P, p["g2"], p["be2"])

    # pass-2 BN2 + ReLU
    a2 = scale_shift_relu(y2.reshape(P, C2), sc2, sh2, jnp.float32)
    return jnp.transpose(a2.reshape(N, Ho, Wo, C2), (0, 3, 1, 2))    # NHWC -> NCHW


# ---------------------------------------------------------------------------
# Pure-JAX reference (full module semantics, incl. conv bias) for correctness
# ---------------------------------------------------------------------------
def _ref_forward(x, p):
    def block(x, w, b, g, be, stride, pad):
        y = jax.lax.conv_general_dilated(
            x, w, (stride, stride), [(pad, pad), (pad, pad)],
            dimension_numbers=("NCHW", "OIHW", "NCHW"))
        y = y + b[None, :, None, None]
        mean = jnp.mean(y, axis=(0, 2, 3), keepdims=True)
        var = jnp.mean(jnp.square(y - mean), axis=(0, 2, 3), keepdims=True)
        y = (y - mean) * jax.lax.rsqrt(var + BN_EPS) * g[None, :, None, None] \
            + be[None, :, None, None]
        return jnp.maximum(y, 0.0)

    x = block(x, p["w1"], p["b1"], p["g1"], p["be1"], 2, 0)
    x = block(x, p["w2"], p["b2"], p["g2"], p["be2"], 1, 1)
    return x


# ---------------------------------------------------------------------------
# Main
# ---------------------------------------------------------------------------
if __name__ == "__main__":
    key = jax.random.PRNGKey(0)
    ks = jax.random.split(key, 9)

    params = {
        "w1": 0.05 * jax.random.normal(ks[0], (128, 64, 2, 2), jnp.float32),
        "b1": 0.05 * jax.random.normal(ks[1], (128,), jnp.float32),
        "g1": 1.0 + 0.1 * jax.random.normal(ks[2], (128,), jnp.float32),
        "be1": 0.1 * jax.random.normal(ks[3], (128,), jnp.float32),
        "w2": 0.02 * jax.random.normal(ks[4], (128, 128, 3, 3), jnp.float32),
        "b2": 0.05 * jax.random.normal(ks[5], (128,), jnp.float32),
        "g2": 1.0 + 0.1 * jax.random.normal(ks[6], (128,), jnp.float32),
        "be2": 0.1 * jax.random.normal(ks[7], (128,), jnp.float32),
    }

    # Channels (64) are fixed by the module; keep batch / spatial dims small.
    x = jax.random.normal(ks[8], (2, 64, 16, 16), jnp.float32)

    out = jax.block_until_ready(jax.jit(vgg16_layer2_forward)(x, params))
    assert out.shape == (2, 128, 8, 8), out.shape

    ref = jax.block_until_ready(jax.jit(_ref_forward)(x, params))
    out_np, ref_np = np.asarray(out), np.asarray(ref)
    # bf16 MXU operands / bf16 intermediates -> allow a few % deviation.
    if not np.allclose(out_np, ref_np, rtol=5e-2, atol=5e-2):
        raise AssertionError(
            f"Pallas output mismatch vs JAX reference "
            f"(max |err| = {np.max(np.abs(out_np - ref_np))})")

    print("KERNEL_OK")
</pallas_src>

<mosaic_0001>
module attributes {stable_mosaic.version = 11 : i64} {
  func.func @_conv1_matmul_stats_kernel(%arg0: i32, %arg1: memref<64x256xbf16, #tpu.memory_space<vmem>>, %arg2: memref<256x128xbf16, #tpu.memory_space<vmem>>, %arg3: memref<64x128xbf16, #tpu.memory_space<vmem>>, %arg4: memref<1x8x128xf32, #tpu.memory_space<vmem>>) attributes {dimension_semantics = [#tpu.dimension_semantics<parallel>], iteration_bounds = array<i64: 2>, scalar_prefetch = 0 : i64, scratch_operands = 0 : i64, tpu.core_type = #tpu.core_type<tc>, window_params = [{transform_indices = @transform_0, window_bounds = array<i64: 64, 256>}, {pipeline_mode = #tpu.pipeline_mode<synchronous>, transform_indices = @transform_1, window_bounds = array<i64: 256, 128>}, {transform_indices = @transform_2, window_bounds = array<i64: 64, 128>}, {transform_indices = @transform_3, window_bounds = array<i64: 1, 8, 128>}]} {
    %c0 = arith.constant 0 : index
    %c0_0 = arith.constant 0 : index
    %0 = vector.load %arg1[%c0, %c0_0] : memref<64x256xbf16, #tpu.memory_space<vmem>>, vector<64x256xbf16>
    %c0_1 = arith.constant 0 : index
    %c0_2 = arith.constant 0 : index
    %1 = vector.load %arg2[%c0_1, %c0_2] : memref<256x128xbf16, #tpu.memory_space<vmem>>, vector<256x128xbf16>
    %cst = arith.constant dense<0.000000e+00> : vector<64x128xf32>
    %2 = tpu.matmul %0, %1, %cst {dimension_numbers = #tpu.dot_dimension_numbers<[1], [0], [0], [1], [0, 0, 1, 1], [], []>} : vector<64x256xbf16>, vector<256x128xbf16>, vector<64x128xf32> -> vector<64x128xf32>
    %3 = arith.truncf %2 : vector<64x128xf32> to vector<64x128xbf16>
    %c0_3 = arith.constant 0 : index
    %c0_4 = arith.constant 0 : index
    %4 = vector.load %arg3[%c0_3, %c0_4] : memref<64x128xbf16, #tpu.memory_space<vmem>>, vector<64x128xbf16>
    tpu.vector_store %arg3[%c0_3, %c0_4], %3 {strides = array<i32>} : memref<64x128xbf16, #tpu.memory_space<vmem>>, vector<64x128xbf16>,
    %cst_5 = arith.constant dense<0.000000e+00> : vector<128xf32>
    %5 = vector.multi_reduction <add>, %2, %cst_5 [0] : vector<64x128xf32> to vector<128xf32>
    %6 = vector.shape_cast %5 : vector<128xf32> to vector<1x128xf32>
    %7 = arith.mulf %2, %2 : vector<64x128xf32>
    %cst_6 = arith.constant dense<0.000000e+00> : vector<128xf32>
    %8 = vector.multi_reduction <add>, %7, %cst_6 [0] : vector<64x128xf32> to vector<128xf32>
    %9 = vector.shape_cast %8 : vector<128xf32> to vector<1x128xf32>
    %10 = tpu.iota {dimensions = array<i32: 0>} : vector<8x128xi32>
    %c0_i32 = arith.constant 0 : i32
    %11 = vector.broadcast %c0_i32 : i32 to vector<8x128xi32>
    %12 = arith.cmpi eq, %10, %11 : vector<8x128xi32>
    %c1_i32 = arith.constant 1 : i32
    %13 = vector.broadcast %c1_i32 : i32 to vector<8x128xi32>
    %14 = arith.cmpi eq, %10, %13 : vector<8x128xi32>
    %cst_7 = arith.constant 0.000000e+00 : f32
    %15 = vector.shape_cast %9 : vector<1x128xf32> to vector<1x128xf32>
    %16 = vector.broadcast %15 : vector<1x128xf32> to vector<8x128xf32>
    %17 = vector.broadcast %cst_7 : f32 to vector<8x128xf32>
    %18 = arith.select %14, %16, %17 : vector<8x128xi1>, vector<8x128xf32>
    %19 = vector.shape_cast %6 : vector<1x128xf32> to vector<1x128xf32>
    %20 = vector.broadcast %19 : vector<1x128xf32> to vector<8x128xf32>
    %21 = arith.select %12, %20, %18 : vector<8x128xi1>, vector<8x128xf32>
    %22 = vector.shape_cast %21 : vector<8x128xf32> to vector<1x8x128xf32>
    %c0_8 = arith.constant 0 : index
    %c0_9 = arith.constant 0 : index
    %c0_10 = arith.constant 0 : index
    %23 = vector.load %arg4[%c0_8, %c0_9, %c0_10] : memref<1x8x128xf32, #tpu.memory_space<vmem>>, vector<1x8x128xf32>
    tpu.vector_store %arg4[%c0_8, %c0_9, %c0_10], %22 {strides = array<i32>} : memref<1x8x128xf32, #tpu.memory_space<vmem>>, vector<1x8x128xf32>,
    return
  }
  func.func @transform_0(%arg0: i32) -> (i32, i32) {
    %c0_i32 = arith.constant 0 : i32
    %c0_i32_0 = arith.constant 0 : i32
    return %arg0, %c0_i32 : i32, i32
  }
  func.func @transform_1(%arg0: i32) -> (i32, i32) {
    %c0_i32 = arith.constant 0 : i32
    %c0_i32_0 = arith.constant 0 : i32
    %c0_i32_1 = arith.constant 0 : i32
    return %c0_i32, %c0_i32_0 : i32, i32
  }
  func.func @transform_2(%arg0: i32) -> (i32, i32) {
    %c0_i32 = arith.constant 0 : i32
    %c0_i32_0 = arith.constant 0 : i32
    return %arg0, %c0_i32 : i32, i32
  }
  func.func @transform_3(%arg0: i32) -> (i32, i32, i32) {
    %c0_i32 = arith.constant 0 : i32
    %c0_i32_0 = arith.constant 0 : i32
    %c0_i32_1 = arith.constant 0 : i32
    return %arg0, %c0_i32, %c0_i32_0 : i32, i32, i32
  }
}

module attributes {stable_mosaic.version = 11 : i64} {
  func.func @_conv2_fused_kernel(%arg0: i32, %arg1: memref<1x8x8x128xbf16, #tpu.memory_space<vmem>>, %arg2: memref<1x128xf32, #tpu.memory_space<vmem>>, %arg3: memref<1x128xf32, #tpu.memory_space<vmem>>, %arg4: memref<3x3x128x128xbf16, #tpu.memory_space<vmem>>, %arg5: memref<1x8x8x128xbf16, #tpu.memory_space<vmem>>, %arg6: memref<1x8x128xf32, #tpu.memory_space<vmem>>, %arg7: memref<1x10x10x128xbf16, #tpu.memory_space<vmem>>) attributes {dimension_semantics = [#tpu.dimension_semantics<parallel>], iteration_bounds = array<i64: 2>, scalar_prefetch = 0 : i64, scratch_operands = 1 : i64, tpu.core_type = #tpu.core_type<tc>, window_params = [{transform_indices = @transform_0, window_bounds = array<i64: 1, 8, 8, 128>}, {pipeline_mode = #tpu.pipeline_mode<synchronous>, transform_indices = @transform_1, window_bounds = array<i64: 1, 128>}, {pipeline_mode = #tpu.pipeline_mode<synchronous>, transform_indices = @transform_2, window_bounds = array<i64: 1, 128>}, {pipeline_mode = #tpu.pipeline_mode<synchronous>, transform_indices = @transform_3, window_bounds = array<i64: 3, 3, 128, 128>}, {transform_indices = @transform_4, window_bounds = array<i64: 1, 8, 8, 128>}, {transform_indices = @transform_5, window_bounds = array<i64: 1, 8, 128>}]} {
    %cst = arith.constant 0.000000e+00 : bf16
    %0 = vector.broadcast %cst : bf16 to vector<1x10x10x128xbf16>
    %c0 = arith.constant 0 : index
    %c0_0 = arith.constant 0 : index
    %c0_1 = arith.constant 0 : index
    %c0_2 = arith.constant 0 : index
    %1 = vector.load %arg7[%c0, %c0_0, %c0_1, %c0_2] : memref<1x10x10x128xbf16, #tpu.memory_space<vmem>>, vector<1x10x10x128xbf16>
    tpu.vector_store %arg7[%c0, %c0_0, %c0_1, %c0_2], %0 {strides = array<i32>} : memref<1x10x10x128xbf16, #tpu.memory_space<vmem>>, vector<1x10x10x128xbf16>,
    %c0_3 = arith.constant 0 : index
    %c0_4 = arith.constant 0 : index
    %c0_5 = arith.constant 0 : index
    %c0_6 = arith.constant 0 : index
    %2 = vector.load %arg1[%c0_3, %c0_4, %c0_5, %c0_6] : memref<1x8x8x128xbf16, #tpu.memory_space<vmem>>, vector<1x8x8x128xbf16>
    %3 = arith.extf %2 : vector<1x8x8x128xbf16> to vector<1x8x8x128xf32>
    %c0_7 = arith.constant 0 : index
    %c0_8 = arith.constant 0 : index
    %4 = vector.load %arg2[%c0_7, %c0_8] : memref<1x128xf32, #tpu.memory_space<vmem>>, vector<1x128xf32>
    %5 = vector.shape_cast %4 : vector<1x128xf32> to vector<1x1x1x128xf32>
    %6 = vector.broadcast %5 : vector<1x1x1x128xf32> to vector<1x8x8x128xf32>
    %7 = arith.mulf %3, %6 : vector<1x8x8x128xf32>
    %c0_9 = arith.constant 0 : index
    %c0_10 = arith.constant 0 : index
    %8 = vector.load %arg3[%c0_9, %c0_10] : memref<1x128xf32, #tpu.memory_space<vmem>>, vector<1x128xf32>
    %9 = vector.shape_cast %8 : vector<1x128xf32> to vector<1x1x1x128xf32>
    %10 = vector.broadcast %9 : vector<1x1x1x128xf32> to vector<1x8x8x128xf32>
    %11 = arith.addf %7, %10 : vector<1x8x8x128xf32>
    %cst_11 = arith.constant 0.000000e+00 : f32
    %12 = vector.broadcast %cst_11 : f32 to vector<1x8x8x128xf32>
    %13 = arith.maximumf %11, %12 : vector<1x8x8x128xf32>
    %14 = arith.truncf %13 : vector<1x8x8x128xf32> to vector<1x8x8x128xbf16>
    %c0_12 = arith.constant 0 : index
    %c1 = arith.constant 1 : index
    %c1_13 = arith.constant 1 : index
    %c0_14 = arith.constant 0 : index
    %15 = vector.load %arg7[%c0_12, %c1, %c1_13, %c0_14] : memref<1x10x10x128xbf16, #tpu.memory_space<vmem>>, vector<1x8x8x128xbf16>
    tpu.vector_store %arg7[%c0_12, %c1, %c1_13, %c0_14], %14 {strides = array<i32>} : memref<1x10x10x128xbf16, #tpu.memory_space<vmem>>, vector<1x8x8x128xbf16>,
    %cst_15 = arith.constant 0.000000e+00 : f32
    %16 = vector.broadcast %cst_15 : f32 to vector<64x128xf32>
    %c0_16 = arith.constant 0 : index
    %c0_17 = arith.constant 0 : index
    %c0_18 = arith.constant 0 : index
    %c0_19 = arith.constant 0 : index
    %17 = vector.load %arg7[%c0_16, %c0_17, %c0_18, %c0_19] : memref<1x10x10x128xbf16, #tpu.memory_space<vmem>>, vector<1x8x8x128xbf16>
    %18 = vector.shape_cast %17 : vector<1x8x8x128xbf16> to vector<64x128xbf16>
    %c0_20 = arith.constant 0 : index
    %c0_21 = arith.constant 0 : index
    %c0_22 = arith.constant 0 : index
    %c0_23 = arith.constant 0 : index
    %19 = vector.load %arg4[%c0_20, %c0_21, %c0_22, %c0_23] : memref<3x3x128x128xbf16, #tpu.memory_space<vmem>>, vector<1x1x128x128xbf16>
    %20 = vector.shape_cast %19 : vector<1x1x128x128xbf16> to vector<128x128xbf16>
    %cst_24 = arith.constant dense<0.000000e+00> : vector<64x128xf32>
    %21 = tpu.matmul %18, %20, %cst_24 {dimension_numbers = #tpu.dot_dimension_numbers<[1], [0], [0], [1], [0, 0, 1, 1], [], []>} : vector<64x128xbf16>, vector<128x128xbf16>, vector<64x128xf32> -> vector<64x128xf32>
    %22 = arith.addf %16, %21 : vector<64x128xf32>
    %c0_25 = arith.constant 0 : index
    %c0_26 = arith.constant 0 : index
    %c1_27 = arith.constant 1 : index
    %c0_28 = arith.constant 0 : index
    %23 = vector.load %arg7[%c0_25, %c0_26, %c1_27, %c0_28] : memref<1x10x10x128xbf16, #tpu.memory_space<vmem>>, vector<1x8x8x128xbf16>
    %24 = vector.shape_cast %23 : vector<1x8x8x128xbf16> to vector<64x128xbf16>
    %c0_29 = arith.constant 0 : index
    %c1_30 = arith.constant 1 : index
    %c0_31 = arith.constant 0 : index
    %c0_32 = arith.constant 0 : index
    %25 = vector.load %arg4[%c0_29, %c1_30, %c0_31, %c0_32] : memref<3x3x128x128xbf16, #tpu.memory_space<vmem>>, vector<1x1x128x128xbf16>
    %26 = vector.shape_cast %25 : vector<1x1x128x128xbf16> to vector<128x128xbf16>
    %cst_33 = arith.constant dense<0.000000e+00> : vector<64x128xf32>
    %27 = tpu.matmul %24, %26, %cst_33 {dimension_numbers = #tpu.dot_dimension_numbers<[1], [0], [0], [1], [0, 0, 1, 1], [], []>} : vector<64x128xbf16>, vector<128x128xbf16>, vector<64x128xf32> -> vector<64x128xf32>
    %28 = arith.addf %22, %27 : vector<64x128xf32>
    %c0_34 = arith.constant 0 : index
    %c0_35 = arith.constant 0 : index
    %c2 = arith.constant 2 : index
    %c0_36 = arith.constant 0 : index
    %29 = vector.load %arg7[%c0_34, %c0_35, %c2, %c0_36] : memref<1x10x10x128xbf16, #tpu.memory_space<vmem>>, vector<1x8x8x128xbf16>
    %30 = vector.shape_cast %29 : vector<1x8x8x128xbf16> to vector<64x128xbf16>
    %c0_37 = arith.constant 0 : index
    %c2_38 = arith.constant 2 : index
    %c0_39 = arith.constant 0 : index
    %c0_40 = arith.constant 0 : index
    %31 = vector.load %arg4[%c0_37, %c2_38, %c0_39, %c0_40] : memref<3x3x128x128xbf16, #tpu.memory_space<vmem>>, vector<1x1x128x128xbf16>
    %32 = vector.shape_cast %31 : vector<1x1x128x128xbf16> to vector<128x128xbf16>
    %cst_41 = arith.constant dense<0.000000e+00> : vector<64x128xf32>
    %33 = tpu.matmul %30, %32, %cst_41 {dimension_numbers = #tpu.dot_dimension_numbers<[1], [0], [0], [1], [0, 0, 1, 1], [], []>} : vector<64x128xbf16>, vector<128x128xbf16>, vector<64x128xf32> -> vector<64x128xf32>
    %34 = arith.addf %28, %33 : vector<64x128xf32>
    %c0_42 = arith.constant 0 : index
    %c1_43 = arith.constant 1 : index
    %c0_44 = arith.constant 0 : index
    %c0_45 = arith.constant 0 : index
    %35 = vector.load %arg7[%c0_42, %c1_43, %c0_44, %c0_45] : memref<1x10x10x128xbf16, #tpu.memory_space<vmem>>, vector<1x8x8x128xbf16>
    %36 = vector.shape_cast %35 : vector<1x8x8x128xbf16> to vector<64x128xbf16>
    %c1_46 = arith.constant 1 : index
    %c0_47 = arith.constant 0 : index
    %c0_48 = arith.constant 0 : index
    %c0_49 = arith.constant 0 : index
    %37 = vector.load %arg4[%c1_46, %c0_47, %c0_48, %c0_49] : memref<3x3x128x128xbf16, #tpu.memory_space<vmem>>, vector<1x1x128x128xbf16>
    %38 = vector.shape_cast %37 : vector<1x1x128x128xbf16> to vector<128x128xbf16>
    %cst_50 = arith.constant dense<0.000000e+00> : vector<64x128xf32>
    %39 = tpu.matmul %36, %38, %cst_50 {dimension_numbers = #tpu.dot_dimension_numbers<[1], [0], [0], [1], [0, 0, 1, 1], [], []>} : vector<64x128xbf16>, vector<128x128xbf16>, vector<64x128xf32> -> vector<64x128xf32>
    %40 = arith.addf %34, %39 : vector<64x128xf32>
    %c0_51 = arith.constant 0 : index
    %c1_52 = arith.constant 1 : index
    %c1_53 = arith.constant 1 : index
    %c0_54 = arith.constant 0 : index
    %41 = vector.load %arg7[%c0_51, %c1_52, %c1_53, %c0_54] : memref<1x10x10x128xbf16, #tpu.memory_space<vmem>>, vector<1x8x8x128xbf16>
    %42 = vector.shape_cast %41 : vector<1x8x8x128xbf16> to vector<64x128xbf16>
    %c1_55 = arith.constant 1 : index
    %c1_56 = arith.constant 1 : index
    %c0_57 = arith.constant 0 : index
    %c0_58 = arith.constant 0 : index
    %43 = vector.load %arg4[%c1_55, %c1_56, %c0_57, %c0_58] : memref<3x3x128x128xbf16, #tpu.memory_space<vmem>>, vector<1x1x128x128xbf16>
    %44 = vector.shape_cast %43 : vector<1x1x128x128xbf16> to vector<128x128xbf16>
    %cst_59 = arith.constant dense<0.000000e+00> : vector<64x128xf32>
    %45 = tpu.matmul %42, %44, %cst_59 {dimension_numbers = #tpu.dot_dimension_numbers<[1], [0], [0], [1], [0, 0, 1, 1], [], []>} : vector<64x128xbf16>, vector<128x128xbf16>, vector<64x128xf32> -> vector<64x128xf32>
    %46 = arith.addf %40, %45 : vector<64x128xf32>
    %c0_60 = arith.constant 0 : index
    %c1_61 = arith.constant 1 : index
    %c2_62 = arith.constant 2 : index
    %c0_63 = arith.constant 0 : index
    %47 = vector.load %arg7[%c0_60, %c1_61, %c2_62, %c0_63] : memref<1x10x10x128xbf16, #tpu.memory_space<vmem>>, vector<1x8x8x128xbf16>
    %48 = vector.shape_cast %47 : vector<1x8x8x128xbf16> to vector<64x128xbf16>
    %c1_64 = arith.constant 1 : index
    %c2_65 = arith.constant 2 : index
    %c0_66 = arith.constant 0 : index
    %c0_67 = arith.constant 0 : index
    %49 = vector.load %arg4[%c1_64, %c2_65, %c0_66, %c0_67] : memref<3x3x128x128xbf16, #tpu.memory_space<vmem>>, vector<1x1x128x128xbf16>
    %50 = vector.shape_cast %49 : vector<1x1x128x128xbf16> to vector<128x128xbf16>
    %cst_68 = arith.constant dense<0.000000e+00> : vector<64x128xf32>
    %51 = tpu.matmul %48, %50, %cst_68 {dimension_numbers = #tpu.dot_dimension_numbers<[1], [0], [0], [1], [0, 0, 1, 1], [], []>} : vector<64x128xbf16>, vector<128x128xbf16>, vector<64x128xf32> -> vector<64x128xf32>
    %52 = arith.addf %46, %51 : vector<64x128xf32>
    %c0_69 = arith.constant 0 : index
    %c2_70 = arith.constant 2 : index
    %c0_71 = arith.constant 0 : index
    %c0_72 = arith.constant 0 : index
    %53 = vector.load %arg7[%c0_69, %c2_70, %c0_71, %c0_72] : memref<1x10x10x128xbf16, #tpu.memory_space<vmem>>, vector<1x8x8x128xbf16>
    %54 = vector.shape_cast %53 : vector<1x8x8x128xbf16> to vector<64x128xbf16>
    %c2_73 = arith.constant 2 : index
    %c0_74 = arith.constant 0 : index
    %c0_75 = arith.constant 0 : index
    %c0_76 = arith.constant 0 : index
    %55 = vector.load %arg4[%c2_73, %c0_74, %c0_75, %c0_76] : memref<3x3x128x128xbf16, #tpu.memory_space<vmem>>, vector<1x1x128x128xbf16>
    %56 = vector.shape_cast %55 : vector<1x1x128x128xbf16> to vector<128x128xbf16>
    %cst_77 = arith.constant dense<0.000000e+00> : vector<64x128xf32>
    %57 = tpu.matmul %54, %56, %cst_77 {dimension_numbers = #tpu.dot_dimension_numbers<[1], [0], [0], [1], [0, 0, 1, 1], [], []>} : vector<64x128xbf16>, vector<128x128xbf16>, vector<64x128xf32> -> vector<64x128xf32>
    %58 = arith.addf %52, %57 : vector<64x128xf32>
    %c0_78 = arith.constant 0 : index
    %c2_79 = arith.constant 2 : index
    %c1_80 = arith.constant 1 : index
    %c0_81 = arith.constant 0 : index
    %59 = vector.load %arg7[%c0_78, %c2_79, %c1_80, %c0_81] : memref<1x10x10x128xbf16, #tpu.memory_space<vmem>>, vector<1x8x8x128xbf16>
    %60 = vector.shape_cast %59 : vector<1x8x8x128xbf16> to vector<64x128xbf16>
    %c2_82 = arith.constant 2 : index
    %c1_83 = arith.constant 1 : index
    %c0_84 = arith.constant 0 : index
    %c0_85 = arith.constant 0 : index
    %61 = vector.load %arg4[%c2_82, %c1_83, %c0_84, %c0_85] : memref<3x3x128x128xbf16, #tpu.memory_space<vmem>>, vector<1x1x128x128xbf16>
    %62 = vector.shape_cast %61 : vector<1x1x128x128xbf16> to vector<128x128xbf16>
    %cst_86 = arith.constant dense<0.000000e+00> : vector<64x128xf32>
    %63 = tpu.matmul %60, %62, %cst_86 {dimension_numbers = #tpu.dot_dimension_numbers<[1], [0], [0], [1], [0, 0, 1, 1], [], []>} : vector<64x128xbf16>, vector<128x128xbf16>, vector<64x128xf32> -> vector<64x128xf32>
    %64 = arith.addf %58, %63 : vector<64x128xf32>
    %c0_87 = arith.constant 0 : index
    %c2_88 = arith.constant 2 : index
    %c2_89 = arith.constant 2 : index
    %c0_90 = arith.constant 0 : index
    %65 = vector.load %arg7[%c0_87, %c2_88, %c2_89, %c0_90] : memref<1x10x10x128xbf16, #tpu.memory_space<vmem>>, vector<1x8x8x128xbf16>
    %66 = vector.shape_cast %65 : vector<1x8x8x128xbf16> to vector<64x128xbf16>
    %c2_91 = arith.constant 2 : index
    %c2_92 = arith.constant 2 : index
    %c0_93 = arith.constant 0 : index
    %c0_94 = arith.constant 0 : index
    %67 = vector.load %arg4[%c2_91, %c2_92, %c0_93, %c0_94] : memref<3x3x128x128xbf16, #tpu.memory_space<vmem>>, vector<1x1x128x128xbf16>
    %68 = vector.shape_cast %67 : vector<1x1x128x128xbf16> to vector<128x128xbf16>
    %cst_95 = arith.constant dense<0.000000e+00> : vector<64x128xf32>
    %69 = tpu.matmul %66, %68, %cst_95 {dimension_numbers = #tpu.dot_dimension_numbers<[1], [0], [0], [1], [0, 0, 1, 1], [], []>} : vector<64x128xbf16>, vector<128x128xbf16>, vector<64x128xf32> -> vector<64x128xf32>
    %70 = arith.addf %64, %69 : vector<64x128xf32>
    %71 = vector.shape_cast %70 : vector<64x128xf32> to vector<1x8x8x128xf32>
    %72 = arith.truncf %71 : vector<1x8x8x128xf32> to vector<1x8x8x128xbf16>
    %c0_96 = arith.constant 0 : index
    %c0_97 = arith.constant 0 : index
    %c0_98 = arith.constant 0 : index
    %c0_99 = arith.constant 0 : index
    %73 = vector.load %arg5[%c0_96, %c0_97, %c0_98, %c0_99] : memref<1x8x8x128xbf16, #tpu.memory_space<vmem>>, vector<1x8x8x128xbf16>
    tpu.vector_store %arg5[%c0_96, %c0_97, %c0_98, %c0_99], %72 {strides = array<i32>} : memref<1x8x8x128xbf16, #tpu.memory_space<vmem>>, vector<1x8x8x128xbf16>,
    %cst_100 = arith.constant dense<0.000000e+00> : vector<128xf32>
    %74 = vector.multi_reduction <add>, %70, %cst_100 [0] : vector<64x128xf32> to vector<128xf32>
    %75 = vector.shape_cast %74 : vector<128xf32> to vector<1x128xf32>
    %76 = arith.mulf %70, %70 : vector<64x128xf32>
    %cst_101 = arith.constant dense<0.000000e+00> : vector<128xf32>
    %77 = vector.multi_reduction <add>, %76, %cst_101 [0] : vector<64x128xf32> to vector<128xf32>
    %78 = vector.shape_cast %77 : vector<128xf32> to vector<1x128xf32>
    %79 = tpu.iota {dimensions = array<i32: 0>} : vector<8x128xi32>
    %c0_i32 = arith.constant 0 : i32
    %80 = vector.broadcast %c0_i32 : i32 to vector<8x128xi32>
    %81 = arith.cmpi eq, %79, %80 : vector<8x128xi32>
    %c1_i32 = arith.constant 1 : i32
    %82 = vector.broadcast %c1_i32 : i32 to vector<8x128xi32>
    %83 = arith.cmpi eq, %79, %82 : vector<8x128xi32>
    %cst_102 = arith.constant 0.000000e+00 : f32
    %84 = vector.shape_cast %78 : vector<1x128xf32> to vector<1x128xf32>
    %85 = vector.broadcast %84 : vector<1x128xf32> to vector<8x128xf32>
    %86 = vector.broadcast %cst_102 : f32 to vector<8x128xf32>
    %87 = arith.select %83, %85, %86 : vector<8x128xi1>, vector<8x128xf32>
    %88 = vector.shape_cast %75 : vector<1x128xf32> to vector<1x128xf32>
    %89 = vector.broadcast %88 : vector<1x128xf32> to vector<8x128xf32>
    %90 = arith.select %81, %89, %87 : vector<8x128xi1>, vector<8x128xf32>
    %91 = vector.shape_cast %90 : vector<8x128xf32> to vector<1x8x128xf32>
    %c0_103 = arith.constant 0 : index
    %c0_104 = arith.constant 0 : index
    %c0_105 = arith.constant 0 : index
    %92 = vector.load %arg6[%c0_103, %c0_104, %c0_105] : memref<1x8x128xf32, #tpu.memory_space<vmem>>, vector<1x8x128xf32>
    tpu.vector_store %arg6[%c0_103, %c0_104, %c0_105], %91 {strides = array<i32>} : memref<1x8x128xf32, #tpu.memory_space<vmem>>, vector<1x8x128xf32>,
    return
  }
  func.func @transform_0(%arg0: i32) -> (i32, i32, i32, i32) {
    %c0_i32 = arith.constant 0 : i32
    %c0_i32_0 = arith.constant 0 : i32
    %c0_i32_1 = arith.constant 0 : i32
    %c0_i32_2 = arith.constant 0 : i32
    return %arg0, %c0_i32, %c0_i32_0, %c0_i32_1 : i32, i32, i32, i32
  }
  func.func @transform_1(%arg0: i32) -> (i32, i32) {
    %c0_i32 = arith.constant 0 : i32
    %c0_i32_0 = arith.constant 0 : i32
    %c0_i32_1 = arith.constant 0 : i32
    return %c0_i32, %c0_i32_0 : i32, i32
  }
  func.func @transform_2(%arg0: i32) -> (i32, i32) {
    %c0_i32 = arith.constant 0 : i32
    %c0_i32_0 = arith.constant 0 : i32
    %c0_i32_1 = arith.constant 0 : i32
    return %c0_i32, %c0_i32_0 : i32, i32
  }
  func.func @transform_3(%arg0: i32) -> (i32, i32, i32, i32) {
    %c0_i32 = arith.constant 0 : i32
    %c0_i32_0 = arith.constant 0 : i32
    %c0_i32_1 = arith.constant 0 : i32
    %c0_i32_2 = arith.constant 0 : i32
    %c0_i32_3 = arith.constant 0 : i32
    return %c0_i32, %c0_i32_0, %c0_i32_1, %c0_i32_2 : i32, i32, i32, i32
  }
  func.func @transform_4(%arg0: i32) -> (i32, i32, i32, i32) {
    %c0_i32 = arith.constant 0 : i32
    %c0_i32_0 = arith.constant 0 : i32
    %c0_i32_1 = arith.constant 0 : i32
    %c0_i32_2 = arith.constant 0 : i32
    return %arg0, %c0_i32, %c0_i32_0, %c0_i32_1 : i32, i32, i32, i32
  }
  func.func @transform_5(%arg0: i32) -> (i32, i32, i32) {
    %c0_i32 = arith.constant 0 : i32
    %c0_i32_0 = arith.constant 0 : i32
    %c0_i32_1 = arith.constant 0 : i32
    return %arg0, %c0_i32, %c0_i32_0 : i32, i32, i32
  }
}

module attributes {stable_mosaic.version = 11 : i64} {
  func.func @_scale_shift_relu_kernel(%arg0: i32, %arg1: memref<64x128xbf16, #tpu.memory_space<vmem>>, %arg2: memref<1x128xf32, #tpu.memory_space<vmem>>, %arg3: memref<1x128xf32, #tpu.memory_space<vmem>>, %arg4: memref<64x128xf32, #tpu.memory_space<vmem>>) attributes {dimension_semantics = [#tpu.dimension_semantics<parallel>], iteration_bounds = array<i64: 2>, scalar_prefetch = 0 : i64, scratch_operands = 0 : i64, tpu.core_type = #tpu.core_type<tc>, window_params = [{transform_indices = @transform_0, window_bounds = array<i64: 64, 128>}, {pipeline_mode = #tpu.pipeline_mode<synchronous>, transform_indices = @transform_1, window_bounds = array<i64: 1, 128>}, {pipeline_mode = #tpu.pipeline_mode<synchronous>, transform_indices = @transform_2, window_bounds = array<i64: 1, 128>}, {transform_indices = @transform_3, window_bounds = array<i64: 64, 128>}]} {
    %c0 = arith.constant 0 : index
    %c0_0 = arith.constant 0 : index
    %0 = vector.load %arg1[%c0, %c0_0] : memref<64x128xbf16, #tpu.memory_space<vmem>>, vector<64x128xbf16>
    %1 = arith.extf %0 : vector<64x128xbf16> to vector<64x128xf32>
    %c0_1 = arith.constant 0 : index
    %c0_2 = arith.constant 0 : index
    %2 = vector.load %arg2[%c0_1, %c0_2] : memref<1x128xf32, #tpu.memory_space<vmem>>, vector<1x128xf32>
    %3 = vector.broadcast %2 : vector<1x128xf32> to vector<64x128xf32>
    %4 = arith.mulf %1, %3 : vector<64x128xf32>
    %c0_3 = arith.constant 0 : index
    %c0_4 = arith.constant 0 : index
    %5 = vector.load %arg3[%c0_3, %c0_4] : memref<1x128xf32, #tpu.memory_space<vmem>>, vector<1x128xf32>
    %6 = vector.broadcast %5 : vector<1x128xf32> to vector<64x128xf32>
    %7 = arith.addf %4, %6 : vector<64x128xf32>
    %cst = arith.constant 0.000000e+00 : f32
    %8 = vector.broadcast %cst : f32 to vector<64x128xf32>
    %9 = arith.maximumf %7, %8 : vector<64x128xf32>
    %c0_5 = arith.constant 0 : index
    %c0_6 = arith.constant 0 : index
    %10 = vector.load %arg4[%c0_5, %c0_6] : memref<64x128xf32, #tpu.memory_space<vmem>>, vector<64x128xf32>
    tpu.vector_store %arg4[%c0_5, %c0_6], %9 {strides = array<i32>} : memref<64x128xf32, #tpu.memory_space<vmem>>, vector<64x128xf32>,
    return
  }
  func.func @transform_0(%arg0: i32) -> (i32, i32) {
    %c0_i32 = arith.constant 0 : i32
    %c0_i32_0 = arith.constant 0 : i32
    return %arg0, %c0_i32 : i32, i32
  }
  func.func @transform_1(%arg0: i32) -> (i32, i32) {
    %c0_i32 = arith.constant 0 : i32
    %c0_i32_0 = arith.constant 0 : i32
    %c0_i32_1 = arith.constant 0 : i32
    return %c0_i32, %c0_i32_0 : i32, i32
  }
  func.func @transform_2(%arg0: i32) -> (i32, i32) {
    %c0_i32 = arith.constant 0 : i32
    %c0_i32_0 = arith.constant 0 : i32
    %c0_i32_1 = arith.constant 0 : i32
    return %c0_i32, %c0_i32_0 : i32, i32
  }
  func.func @transform_3(%arg0: i32) -> (i32, i32) {
    %c0_i32 = arith.constant 0 : i32
    %c0_i32_0 = arith.constant 0 : i32
    return %arg0, %c0_i32 : i32, i32
  }
}

</mosaic_0001>

<bundles_post_ra>
// kernel: vgg16_layer2_forward.3
= control target key start
LH: loop header
LB: loop body
LE: loop exit
PB: predicated region body
PF: predicated region fallthrough
CT: control target
= control target key end

     0   :  { %s795_s12 = smov 0   ;;  %s888_s0 = inlined_call_operand.vmem [shape: bf16[128,256], index: 0, kind: input, shape index: {}]   ;;  %s889_s1 = inlined_call_operand.vmem [shape: bf16[256,128], index: 1, kind: input, shape index: {}]   ;;  %s890_s2 = inlined_call_operand.vmem [shape: bf16[128,128], index: 2, kind: output, shape index: {0}]   ;;  %s891_s3 = inlined_call_operand.vmem [shape: f32[2,8,128], index: 3, kind: output, shape index: {1}]  }
   0x1 LB: > { %s801_s13 = sadd.s32 4294967295, %s773_s12   ;;  %p602_p0 = scmp.ge.s32.totalorder %s773_s12, 1  ;;  %s773_s12 = sphi %s795_s12, %s14_s12  }
   0x2   : > { %p142_p1 = scmp.lt.s32.totalorder %s773_s12, 3 }
   0x4   : > { %p143_p2 = pnand %p602_p0, %p142_p1 }
   0x5   : > { %s603_s16 = sshll.u32 (!%p143_p2), %s801_s13, 3  ;;  %p184_p4 = scmp.lt.s32.totalorder (!%p143_p2), %s801_s13, 1 }
   0x6   : > { %146 = sbr.rel (%p143_p2) target bundleno = 280 (0x118), region = 28  ;;  %p172_p3 = scmp.lt.s32.totalorder (!%p143_p2), %s603_s16, 15 }
   0xb   : > { %v739_v0 = vld [vmem:[%s889_s1 + $0x78] sm:$0xff]   ;;  %v741_v2 = vld [vmem:[%s889_s1 + $0x70] sm:$0xff]   ;;  %v743_v4 = vld [vmem:[%s889_s1 + $0x68] sm:$0xff]   ;;  %s893_s16 = smov (!%p172_p3, %s603_s16), 15  ;;  %s895_s13 = smov (!%p184_p4, %s801_s13), 1 }
   0xc   : > { %v740_v1 = vld [vmem:[%s889_s1 + $0x38] sm:$0xff]   ;;  %675 = vmatprep.subr.bf16.mxu0 %v739_v0  ;;  %715 = vmatprep.subr.bf16.mxu1 %v739_v0  ;;  %v742_v3 = vld [vmem:[%s889_s1 + $0x30] sm:$0xff]   ;;  %v744_v5 = vld [vmem:[%s889_s1 + $0x28] sm:$0xff]   ;;  %s643_s4 = sshll.u32 %s893_s16, 3  ;;  %s607_s27 = sshll.u32 %s893_s16, 2 }
   0xd   : > { %676 = vmatpush3.bf16.msra.mxu0 %v740_v1  ;;  %723 = vmatpush3.bf16.msra.mxu1 %v740_v1  ;;  %v745_v6 = vld [vmem:[%s889_s1 + $0x60] sm:$0xff]   ;;  %v747_v8 = vld [vmem:[%s889_s1 + $0x58] sm:$0xff]   ;;  %s839_s9 = scalar_lea.vmem %s888_s0, %s643_s4  ;;  %v749_v10 = vld [vmem:[%s889_s1 + $0x50] sm:$0xff]   ;;  %s874_s30 = scalar_lea.vmem %s890_s2, %s607_s27 }
   0xe   : > { %677 = vmatprep.subr.bf16.mxu0 %v741_v2  ;;  %716 = vmatprep.subr.bf16.mxu1 %v741_v2  ;;  %v746_v7 = vld [vmem:[%s889_s1 + $0x20] sm:$0xff]   ;;  %v748_v9 = vld [vmem:[%s889_s1 + $0x18] sm:$0xff]   ;;  %v750_v13 = vld [vmem:[%s889_s1 + $0x10] sm:$0xff]   ;;  %s608_s16 = sshll.u32 %s895_s13, 3 }
   0xf   : > { %v757_v11 = vld [vmem:[%s839_s9 + $0x4] ss:$8 sps:$4 sm:$0xff]   ;;  %v755_v18 = vld [vmem:[%s839_s9] ss:$8 sps:$4 sm:$0xff]   ;;  %v761_v20 = vld [vmem:[%s839_s9 + $0x14] ss:$8 sps:$4 sm:$0xff]   ;;  %s187_s6 = scalar_lea.vmem %s891_s3, %s608_s16 }
  0x10   : > { %v760_v12 = vld [vmem:[%s839_s9 + $0x24] ss:$8 sps:$4 sm:$0xff]   ;;  %397 = vmatprep.mubr.bf16.mxu0 %v757_v11  ;;  %v758_v19 = vld [vmem:[%s839_s9 + $0x20] ss:$8 sps:$4 sm:$0xff]   ;;  %v764_v21 = vld [vmem:[%s839_s9 + $0x34] ss:$8 sps:$4 sm:$0xff]  }
  0x11   : > { %678 = vmatpush3.bf16.msra.mxu0 %v742_v3  ;;  %724 = vmatpush3.bf16.msra.mxu1 %v742_v3  ;;  %v751_v14 = vld [vmem:[%s889_s1 + $0x48] sm:$0xff]   ;;  %v753_v16 = vld [vmem:[%s889_s1 + $0x40] sm:$0xff]   ;;  %v763_v22 = vld [vmem:[%s839_s9 + $0x10] ss:$8 sps:$4 sm:$0xff]  }
  0x12   : > { %679 = vmatprep.subr.bf16.mxu0 %v743_v4  ;;  %717 = vmatprep.subr.bf16.mxu1 %v743_v4  ;;  %v752_v15 = vld [vmem:[%s889_s1 + $0x8] sm:$0xff]   ;;  %v754_v17 = vld [vmem:[%s889_s1] sm:$0xff]   ;;  %v766_v23 = vld [vmem:[%s839_s9 + $0x30] ss:$8 sps:$4 sm:$0xff]  }
  0x13   : > { %413 = vmatprep.mubr.bf16.mxu1 %v760_v12 }
  0x15   : > { %680 = vmatpush3.bf16.msra.mxu0 %v744_v5  ;;  %725 = vmatpush3.bf16.msra.mxu1 %v744_v5 }
  0x16   : > { %681 = vmatprep.subr.bf16.mxu0 %v745_v6  ;;  %718 = vmatprep.subr.bf16.mxu1 %v745_v6 }
  0x19   : > { %682 = vmatpush3.bf16.msra.mxu0 %v746_v7  ;;  %726 = vmatpush3.bf16.msra.mxu1 %v746_v7 }
  0x1a   : > { %683 = vmatprep.subr.bf16.mxu0 %v747_v8  ;;  %719 = vmatprep.subr.bf16.mxu1 %v747_v8 }
  0x1d   : > { %684 = vmatpush3.bf16.msra.mxu0 %v748_v9  ;;  %727 = vmatpush3.bf16.msra.mxu1 %v748_v9 }
  0x1e   : > { %685 = vmatprep.subr.bf16.mxu0 %v749_v10  ;;  %720 = vmatprep.subr.bf16.mxu1 %v749_v10 }
  0x21   : > { %686 = vmatpush3.bf16.msra.mxu0 %v750_v13  ;;  %728 = vmatpush3.bf16.msra.mxu1 %v750_v13  ;;  %v504_v13 = vlaneseq }
  0x22   : > { %687 = vmatprep.subr.bf16.mxu0 %v751_v14  ;;  %721 = vmatprep.subr.bf16.mxu1 %v751_v14 }
  0x25   : > { %688 = vmatpush3.bf16.msra.mxu0 %v752_v15  ;;  %729 = vmatpush3.bf16.msra.mxu1 %v752_v15 }
  0x26   : > { %689 = vmatprep.subr.bf16.mxu0 %v753_v16  ;;  %722 = vmatprep.subr.bf16.mxu1 %v753_v16 }
  0x29   : > { %690 = vmatpush3.bf16.msra.mxu0 %v754_v17  ;;  %730 = vmatpush3.bf16.msra.mxu1 %v754_v17 }
  0x2c   : > { %398 = vmatmul.mubr.bf16.vlgmr.msra.gmra.mxu0 %v755_v18  ;;  %414 = vmatmul.mubr.bf16.vlgmr.msra.gmra.mxu1 %v758_v19  ;;  %v505_v18 = vshrl.u32 %v504_v13, 7 }
  0x2d   : > { %405 = vmatprep.mubr.bf16.mxu0 %v761_v20  ;;  %421 = vmatprep.mubr.bf16.mxu1 %v764_v21 }
  0x2e   : > { %vm507_vm0 = vcmp.eq.s32.totalorder %v505_v18, 1  ;;  %vm506_vm1 = vcmp.eq.s32.totalorder %v505_v18, 0 }
  0x34   : > { %406 = vmatmul.mubr.bf16.gmra.mxu0 %v763_v22  ;;  %422 = vmatmul.mubr.bf16.gmra.mxu1 %v766_v23 }
  0xec   : > { %v691_v24 = vpop.f32.mrf.mxu0  ;;  %v703_v25 = vpop.f32.mrf.mxu1 }
  0xee   : > { %v692_v26 = vpop.f32.mrf.mxu0  ;;  %v704_v27 = vpop.f32.mrf.mxu1 }
  0xef   : > { %v705_v30 = vadd.f32 %v704_v27, %v703_v25  ;;  %v693_v33 = vadd.f32 %v692_v26, %v691_v24 }
  0xf0   : > { %v694_v28 = vpop.f32.mrf.mxu0  ;;  %v706_v29 = vpop.f32.mrf.mxu1 }
  0xf1   : > { %v483_v44 = vmul.f32 %v693_v33, %v693_v33  ;;  %v487_v61 = vmul.f32 %v705_v30, %v705_v30 }
  0xf2   : > { %v695_v31 = vpop.f32.mrf.mxu0  ;;  %v707_v32 = vpop.f32.mrf.mxu1 }
  0xf3   : > { %v696_v34 = vadd.f32 %v695_v31, %v694_v28  ;;  %v708_v35 = vadd.f32 %v707_v32, %v706_v29 }
  0xf4   : > { %v697_v36 = vpop.f32.mrf.mxu0  ;;  %v709_v37 = vpop.f32.mrf.mxu1 }
  0xf5   : > { %v655_v38 = vpack.c.bf16 %v696_v34, %v693_v33  ;;  %v665_v39 = vpack.c.bf16 %v708_v35, %v705_v30  ;;  %v484_v40 = vmul.f32 %v696_v34, %v696_v34  ;;  %v470_v47 = vadd.f32 %v696_v34, %v693_v33 }
  0xf6   : > { %v698_v41 = vpop.f32.mrf.mxu0  ;;  %v710_v42 = vpop.f32.mrf.mxu1  ;;  %v488_v0 = vmul.f32 %v708_v35, %v708_v35 }
  0xf7   : > { %656 = vst [vmem:[%s874_s30] sm:$0xff] %v655_v38   ;;  %673 = vst [vmem:[%s874_s30 + $0x10] sm:$0xff] %v665_v39   ;;  %v699_v43 = vadd.f32 %v698_v41, %v697_v36  ;;  %v711_v49 = vadd.f32 %v710_v42, %v709_v37  ;;  %v491_v50 = vadd.f32 %v484_v40, %v483_v44 }
  0xf8   : > { %v700_v45 = vpop.f32.mrf.mxu0  ;;  %v712_v46 = vpop.f32.mrf.mxu1 }
  0xf9   : > { %v485_v48 = vmul.f32 %v699_v43, %v699_v43  ;;  %v471_v53 = vadd.f32 %v699_v43, %v470_v47  ;;  %v489_v3 = vmul.f32 %v711_v49, %v711_v49 }
  0xfa   : > { %v701_v51 = vpop.f32.mrf.mxu0  ;;  %v713_v52 = vpop.f32.mrf.mxu1 }
  0xfb   : > { %v702_v54 = vadd.f32 %v701_v51, %v700_v45  ;;  %v714_v55 = vadd.f32 %v713_v52, %v712_v46  ;;  %v492_v56 = vadd.f32 %v491_v50, %v485_v48 }
  0xfd   : > { %v660_v57 = vpack.c.bf16 %v702_v54, %v699_v43  ;;  %v472_v58 = vadd.f32 %v702_v54, %v471_v53  ;;  %v486_v59 = vmul.f32 %v702_v54, %v702_v54  ;;  %v670_v60 = vpack.c.bf16 %v714_v55, %v711_v49 }
  0xfe   : > { %v490_v7 = vmul.f32 %v714_v55, %v714_v55 }
  0xff   : > { %672 = vst [vmem:[%s874_s30 + $0x8] sm:$0xff] %v660_v57   ;;  %v473_v62 = vadd.f32 %v705_v30, %v472_v58  ;;  %v493_v63 = vadd.f32 %v492_v56, %v486_v59  ;;  %674 = vst [vmem:[%s874_s30 + $0x18] sm:$0xff] %v670_v60  }
 0x101   : > { %v494_v1 = vadd.f32 %v493_v63, %v487_v61  ;;  %v474_v2 = vadd.f32 %v708_v35, %v473_v62 }
 0x103   : > { %v475_v4 = vadd.f32 %v711_v49, %v474_v2  ;;  %v495_v5 = vadd.f32 %v494_v1, %v488_v0 }
 0x105   : > { %v476_v6 = vadd.f32 %v714_v55, %v475_v4  ;;  %v496_v8 = vadd.f32 %v495_v5, %v489_v3 }
 0x107   : > { %v477_v9 = vrot.slane %v476_v6, 4  ;;  %v497_v10 = vadd.f32 %v496_v8, %v490_v7 }
 0x109   : > { %v478_v11 = vadd.f32 %v477_v9, %v476_v6  ;;  %v498_v12 = vrot.slane %v497_v10, 4 }
 0x10b   : > { %v479_v14 = vrot.slane %v478_v11, 2  ;;  %v499_v15 = vadd.f32 %v498_v12, %v497_v10 }
 0x10d   : > { %v480_v16 = vadd.f32 %v479_v14, %v478_v11  ;;  %v500_v17 = vrot.slane %v499_v15, 2 }
 0x10f   : > { %v501_v19 = vadd.f32 %v500_v17, %v499_v15  ;;  %v481_v20 = vrot.slane %v480_v16, 1 }
 0x111   : > { %v502_v21 = vrot.slane %v501_v19, 1  ;;  %v482_v23 = vadd.f32 %v481_v20, %v480_v16 }
 0x113   : > { %v503_v22 = vadd.f32 %v502_v21, %v501_v19 }
 0x115   : > { %v508_v24 = vsel %vm507_vm0, %v503_v22, 0.0 }
 0x116   : > { %v509_v25 = vsel %vm506_vm1, %v482_v23, %v508_v24 }
 0x117   : > { %510 = vst [vmem:[%s187_s6] sm:$0xff] %v509_v25 }
 0x118 PF: > { %s14_s12 = sadd.s32 1, %s773_s12  }
 0x119   : > { %p11_p5 = scmp.ge.s32.totalorder %s14_s12, 4  }
 0x11b   :  { %13 = sbr.rel (!%p11_p5) target bundleno = 1 (0x1), region = 70 }

// kernel: vgg16_layer2_forward.5
= control target key start
LH: loop header
LB: loop body
LE: loop exit
PB: predicated region body
PF: predicated region fallthrough
CT: control target
= control target key end

     0   :  { %8 = vsyncpa [#allocation3], 0  ;;  %s592_s0 = inlined_call_operand.vmem [shape: bf16[128,128], index: 0, kind: input, shape index: {}]   ;;  %s593_s1 = inlined_call_operand.vmem [shape: f32[1,128], index: 1, kind: input, shape index: {}]   ;;  %s594_s2 = inlined_call_operand.vmem [shape: f32[1,128], index: 2, kind: input, shape index: {}]   ;;  %s595_s3 = inlined_call_operand.hbm [shape: f32[128,128], index: 3, kind: output, shape index: {}]  }
   0x1   :  { %10 = vsyncpa [#allocation3 + $0x1], 0  ;;  %s470_s12 = smov 0   ;;  %s472_s13 = smov 0  }
   0x2   :  { %s474_s14 = smov 0   ;;  %s476_s15 = smov 0  }
   0x3 LB: > { %s491_s16 = sadd.s32 4294967295, %s445_s15   ;;  %s310_s17 = sadd.s32 4294967294, %s445_s15   ;;  %s445_s15 = sphi %s476_s15, %s601_s15   ;;  %s441_s14 = sphi %s474_s14, %s600_s14   ;;  %s437_s13 = sphi %s472_s13, %s599_s13   ;;  %s433_s12 = sphi %s470_s12, %s598_s12  }
   0x4   : > { %s495_s18 = sadd.s32 1, %s445_s15   ;;  %s91_s19 = sadd.s32 1, %s441_s14 }
   0x5   : > { %s88_s20 = ssub.s32 %s445_s15, %s495_s18  ;;  %p101_p0 = scmp.ne.s32.totalorder %s441_s14, %s437_s13 }
   0x6   : > { %p89_p1 = scmp.eq.s32.totalorder %s88_s20, 0  ;;  %p102_p2 = scmp.eq.s32.totalorder %s491_s16, 1 }
   0x7   : > { %p107_p3 = scmp.ne.s32.totalorder %s437_s13, %s433_s12  ;;  %p108_p4 = scmp.eq.s32.totalorder %s310_s17, 1 }
   0x8   : > { %s506_s21 = scalar_select %p89_p1, %s441_s14, %s91_s19  }
   0x9   : > { %p508_p5 = por %p102_p2, %p101_p0  ;;  %p512_p6 = por %p108_p4, %p107_p3 }
   0xa   : > { %p313_p7 = scmp.ge.s32.totalorder %s445_s15, 1  ;;  %p141_p8 = scmp.lt.s32.totalorder %s445_s15, 3 }
   0xc   : > { %p142_p9 = pnand %p313_p7, %p141_p8 }
   0xd   : > { %s315_s24 = sshll.u32 (!%p142_p9), %s491_s16, 3  ;;  %s162_s25 = sand.u32 (!%p142_p9), 1, %s437_s13  }
   0xe   : > { %145 = sbr.rel (%p142_p9) target bundleno = 48 (0x30), region = 32  ;;  %p166_p10 = scmp.lt.s32.totalorder (!%p142_p9), %s315_s24, 15 }
   0xf   : > { %s314_s26 = sshll.u32 (!%p142_p9), %s162_s25, 6  ;;  %s324_s10 = sshll.u32 (!%p142_p9), %s491_s16, 10 }
  0x10   : > { %s531_s8 = scalar_lea.vmem (!%p142_p9), [#allocation2], %s314_s26  ;;  %s540_s17 = scalar_lea.hbm (!%p142_p9), %s595_s3, %s324_s10 }
  0x11   : > { %s248_s9 = sshll.u32 (!%p142_p9), %s531_s8, 4  ;;  %s552_s19 = scalar_lea.sflag (!%p142_p9), [#allocation3], %s162_s25  ;;  %s535_s9 = int_to_ptr.vmem [resolvable:$true] %s248_s9 }
  0x12   : > { %s385_s20 = scalar_lea.vmem (!%p142_p9), %s535_s9, 1024 }
  0x13   : > { %s603_s24 = smov (!%p166_p10, %s315_s24), 15  ;;  %v317_v0 = vld [vmem:[%s593_s1] ss:$0 sm:$0xff]  ;;  %p386_p11 = scmp.ne.s32.totalorder %s535_s9, %s385_s20 }
  0x14   : > { %s316_s27 = sshll.u32 %s603_s24, 2  ;;  %v318_v9 = vld [vmem:[%s594_s2] ss:$0 sm:$0xff]  ;;  %s447_s24 = smov [#allocation2]  }
  0x15   : > { %s169_s30 = scalar_lea.vmem %s592_s0, %s316_s27  ;;  %p387_p12 = pnand %p386_p11, %p508_p5 }
  0x16   : > { %v326_v1 = vld [vmem:[%s169_s30] sm:$0xff]   ;;  %v341_v2 = vld [vmem:[%s169_s30 + $0x8] sm:$0xff]   ;;  %v342_v3 = vld [vmem:[%s169_s30 + $0x10] sm:$0xff]   ;;  %s389_s26 = sshll.u32 %s447_s24, 4  ;;  %s390_s26 = int_to_ptr.vmem [resolvable:$false] %s389_s26 }
  0x17   : > { %v327_v4 = vunpack.c.l.bf16 %v326_v1  ;;  %v328_v5 = vunpack.c.h.bf16 %v326_v1  ;;  %v331_v6 = vunpack.c.l.bf16 %v341_v2  ;;  %v332_v7 = vunpack.c.h.bf16 %v341_v2  ;;  %v343_v8 = vld [vmem:[%s169_s30 + $0x18] sm:$0xff]   ;;  %p388_p13 = pneg %p387_p12  ;;  %s391_s27 = scalar_lea.vmem %s390_s26, 2048 }
  0x18   : > { %v335_v10 = vunpack.c.l.bf16 %v342_v3  ;;  %v336_v11 = vunpack.c.h.bf16 %v342_v3  ;;  %v339_v12 = vunpack.c.l.bf16 %v343_v8  ;;  %v340_v13 = vunpack.c.h.bf16 %v343_v8  ;;  %p392_p0 = scmp.lt.s32.totalorder %s535_s9, %s390_s26  ;;  %p393_p1 = scmp.lt.s32.totalorder %s391_s27, %s385_s20 }
  0x19   : > { %v195_v14 = vmul.f32 %v327_v4, %v317_v0  ;;  %v196_v15 = vmul.f32 %v328_v5, %v317_v0  ;;  %v197_v16 = vmul.f32 %v331_v6, %v317_v0  ;;  %v198_v17 = vmul.f32 %v332_v7, %v317_v0 }
  0x1a   : > { %v199_v18 = vmul.f32 %v335_v10, %v317_v0  ;;  %v200_v19 = vmul.f32 %v336_v11, %v317_v0  ;;  %v201_v20 = vmul.f32 %v339_v12, %v317_v0  ;;  %v202_v21 = vmul.f32 %v340_v13, %v317_v0  ;;  %p394_p2 = por %p393_p1, %p392_p0 }
  0x1b   : > { %v210_v22 = vadd.f32 %v318_v9, %v195_v14  ;;  %v211_v23 = vadd.f32 %v318_v9, %v196_v15  ;;  %v212_v24 = vadd.f32 %v318_v9, %v197_v16  ;;  %v213_v25 = vadd.f32 %v318_v9, %v198_v17 }
  0x1c   : > { %v214_v26 = vadd.f32 %v318_v9, %v199_v18  ;;  %v215_v27 = vadd.f32 %v318_v9, %v200_v19  ;;  %v216_v28 = vadd.f32 %v318_v9, %v201_v20  ;;  %v217_v29 = vadd.f32 %v318_v9, %v202_v21  ;;  %p395_p3 = pnand %p394_p2, %p388_p13 }
  0x1d   : > { %v218_v30 = vmax.f32 %v210_v22, 0.0  ;;  %v219_v31 = vmax.f32 %v211_v23, 0.0  ;;  %v220_v32 = vmax.f32 %v212_v24, 0.0  ;;  %v221_v33 = vmax.f32 %v213_v25, 0.0 }
  0x1e   : > { %v222_v34 = vmax.f32 %v214_v26, 0.0  ;;  %v223_v35 = vmax.f32 %v215_v27, 0.0  ;;  %v224_v36 = vmax.f32 %v216_v28, 0.0  ;;  %v225_v37 = vmax.f32 %v217_v29, 0.0 }
  0x1f   : > { %226 = vst [vmem:[%s531_s8] sm:$0xff] %v218_v30  ;;  %227 = vst [vmem:[%s531_s8 + $0x8] sm:$0xff] %v219_v31 }
  0x20   : > { %228 = vst [vmem:[%s531_s8 + $0x10] sm:$0xff] %v220_v32  ;;  %229 = vst [vmem:[%s531_s8 + $0x18] sm:$0xff] %v221_v33 }
  0x21   : > { %230 = vst [vmem:[%s531_s8 + $0x20] sm:$0xff] %v222_v34  ;;  %231 = vst [vmem:[%s531_s8 + $0x28] sm:$0xff] %v223_v35 }
  0x22   : > { %232 = vst [vmem:[%s531_s8 + $0x30] sm:$0xff] %v224_v36  ;;  %233 = vst [vmem:[%s531_s8 + $0x38] sm:$0xff] %v225_v37 }
  0x23   : > { %398 = shalt.err (!%p395_p3)
}
  0x24   : > { %s399_s25 = scalar_lea.hbm %s540_s17, 1024  ;;  %s403_s30 = scalar_lea.hbm %s595_s3, 2048 }
  0x25   : > { %p400_p4 = scmp.ne.s32.totalorder %s540_s17, %s399_s25  ;;  %p404_p9 = scmp.lt.s32.totalorder %s540_s17, %s595_s3 }
  0x26   : > { %p405_p10 = scmp.lt.s32.totalorder %s403_s30, %s399_s25 }
  0x27   : > { %p401_p7 = pnand %p400_p4, %p508_p5 }
  0x28   : > { %p406_p11 = por %p405_p10, %p404_p9 }
  0x29   : > { %p402_p8 = pneg %p401_p7 }
  0x2b   : > { %p407_p12 = pnand %p406_p11, %p402_p8 }
  0x2d   : > { %410 = shalt.err (!%p407_p12)
}
  0x2e   : > { %s448_s6 = smov 128   ;;  %s449_s7 = smov 8  }
  0x2f   : > { %344 = dma.vmem_to_hbm [thread:$0]  (%p508_p5), %s535_s9, 1024, %s540_s17, %s552_s19, %s448_s6, %s448_s6, %s449_s7  }
  0x30 PF: > { %p350_p13 = scmp.ge.s32.totalorder %s445_s15, 2  ;;  %s263_s8 = sand.u32 1, %s433_s12  }
  0x31   : > { %s264_s10 = scalar_lea.sflag [#allocation3], %s263_s8 }
  0x32   : > { %p347_p0 = pnand %p350_p13, %p512_p6 }
  0x34   : > { %p348_p1 = pneg %p347_p0 }
  0x36   : > { %428 = dma.done.wait (%p348_p1), %s264_s10, 1024  }
  0x37   : > { %430 = vsyncadd (%p348_p1), %s264_s10, 4294966272  ;;  %p13_p2 = scmp.ge.s32.totalorder %s495_s18, 4   ;;  %s598_s12 = smov %s437_s13 }
  0x38   : > { %s599_s13 = smov %s441_s14  ;;  %s600_s14 = smov %s506_s21 }
  0x39   : > { %s601_s15 = smov %s495_s18  ;;  %15 = sbr.rel (!%p13_p2) target bundleno = 3 (0x3), region = 67 }
  0x3e   :  { %269 = vsyncpa [#allocation3], 1 }
  0x3f   :  { %271 = vsyncpa [#allocation3 + $0x1], 1 }

// kernel: vgg16_layer2_forward.4
= control target key start
LH: loop header
LB: loop body
LE: loop exit
PB: predicated region body
PF: predicated region fallthrough
CT: control target
= control target key end

     0   :  { %s3395_s18 = smov 0   ;;  %s4102_s0 = inlined_call_operand.vmem [shape: bf16[2,8,8,128], index: 0, kind: input, shape index: {}]   ;;  %s4103_s1 = inlined_call_operand.vmem [shape: f32[1,128], index: 1, kind: input, shape index: {}]   ;;  %s4104_s2 = inlined_call_operand.vmem [shape: f32[1,128], index: 2, kind: input, shape index: {}]   ;;  %s4105_s3 = inlined_call_operand.vmem [shape: bf16[3,3,128,128], index: 3, kind: input, shape index: {}]   ;;  %s4106_s4 = inlined_call_operand.vmem [shape: bf16[2,8,8,128], index: 4, kind: output, shape index: {0}]   ;;  %s4107_s5 = inlined_call_operand.vmem [shape: f32[2,8,128], index: 5, kind: output, shape index: {1}]  }
   0x1 LB: > { %s2589_s19 = sadd.s32 4294967295, %s3362_s18   ;;  %p2593_p0 = scmp.ge.s32.totalorder %s3362_s18, 1  ;;  %s3362_s18 = sphi %s3395_s18, %s16_s18  }
   0x2   : > { %p190_p1 = scmp.lt.s32.totalorder %s3362_s18, 3 }
   0x4   : > { %p191_p2 = pnand %p2593_p0, %p190_p1 }
   0x6   : > { %194 = sbr.rel (%p191_p2) target bundleno = 416 (0x1a0), region = 36 }
   0xb   : > { %v3272_v0 = vld [vmem:[%s4105_s3 + $0x38] sm:$0xff]   ;;  %p3408_p3 = scmp.lt.s32.totalorder %s2589_s19, 1  ;;  %v3273_v1 = vld [vmem:[%s4105_s3 + $0x30] sm:$0xff]   ;;  %v3364_v3 = vmov 0   ;;  %v3275_v4 = vld [vmem:[%s4105_s3 + $0x28] sm:$0xff]   ;;  %vm424_vm0 = vcmask 1043456  }
   0xc   : > { %3055 = vmatprep.subr.bf16.mxu1 %v3272_v0  ;;  %v3274_v2 = vld [vmem:[%s4105_s3 + $0x78] sm:$0xff]   ;;  %237 = vst [vmem:[#allocation2] sm:$0xf] %v3364_v3  ;;  %239 = vst [vmem:[#allocation2 + $0x8] sm:$0xf] %v3364_v3  ;;  %v3276_v5 = vld [vmem:[%s4105_s3 + $0x70] sm:$0xff]  }
   0xd   : > { %238 = vst [vmem:[#allocation2 + $0x4] sm:$0x1] %v3364_v3  ;;  %240 = vst [vmem:[#allocation2 + $0xc] sm:$0x1] %v3364_v3  ;;  %3056 = vmatpush3.bf16.msra.mxu1 %v3272_v0  ;;  %3031 = vmatprep.subr.bf16.mxu0 %v3274_v2  ;;  %s4138_s19 = smov (!%p3408_p3, %s2589_s19), 1  ;;  %v3278_v6 = vld [vmem:[%s4105_s3 + $0x68] sm:$0xff]  }
   0xe   : > { %241 = vst [vmem:[#allocation2 + $0x10] sm:$0xf] %v3364_v3  ;;  %242 = vst [vmem:[#allocation2 + $0x14] sm:$0x1] %v3364_v3  ;;  %3057 = vmatprep.subr.bf16.mxu1 %v3273_v1  ;;  %3032 = vmatpush3.bf16.msra.mxu0 %v3274_v2  ;;  %v3277_v7 = vld [vmem:[%s4105_s3 + $0x20] sm:$0xff]   ;;  %s2871_s10 = sshll.u32 %s4138_s19, 5 }
   0xf   : > { %243 = vst [vmem:[#allocation2 + $0x18] sm:$0xf] %v3364_v3  ;;  %244 = vst [vmem:[#allocation2 + $0x1c] sm:$0x1] %v3364_v3  ;;  %3033 = vmatprep.subr.bf16.mxu0 %v3276_v5  ;;  %v3280_v8 = vld [vmem:[%s4105_s3 + $0x60] sm:$0xff]   ;;  %v3279_v9 = vld [vmem:[%s4105_s3 + $0x18] sm:$0xff]   ;;  %s3448_s17 = scalar_lea.vmem %s4102_s0, %s2871_s10 }
  0x10   : > { %245 = vst [vmem:[#allocation2 + $0x20] sm:$0xf] %v3364_v3  ;;  %246 = vst [vmem:[#allocation2 + $0x24] sm:$0x1] %v3364_v3  ;;  %v3282_v10 = vld [vmem:[%s4105_s3 + $0x58] sm:$0xff]   ;;  %v2882_v11 = vld [vmem:[%s3448_s17] sm:$0xff]  }
  0x11   : > { %247 = vst [vmem:[#allocation2 + $0x28] sm:$0xf] %v3364_v3  ;;  %248 = vst [vmem:[#allocation2 + $0x2c] sm:$0x1] %v3364_v3  ;;  %3058 = vmatpush3.bf16.msra.mxu1 %v3273_v1  ;;  %v3457_v12 = vld [vmem:[%s4103_s1] ss:$0 sm:$0xff]  ;;  %v2883_v14 = vunpack.c.l.bf16 %v2882_v11  ;;  %v2884_v15 = vunpack.c.h.bf16 %v2882_v11 }
  0x12   : > { %249 = vst [vmem:[#allocation2 + $0x30] sm:$0xf] %v3364_v3  ;;  %250 = vst [vmem:[#allocation2 + $0x34] sm:$0x1] %v3364_v3  ;;  %3059 = vmatprep.subr.bf16.mxu1 %v3275_v4  ;;  %3034 = vmatpush3.bf16.msra.mxu0 %v3276_v5  ;;  %v3281_v13 = vld [vmem:[%s4105_s3 + $0x10] sm:$0xff]   ;;  %v2917_v20 = vld [vmem:[%s3448_s17 + $0x8] sm:$0xff]  }
  0x13   : > { %251 = vst [vmem:[#allocation2 + $0x38] sm:$0xf] %v3364_v3  ;;  %252 = vst [vmem:[#allocation2 + $0x3c] sm:$0x1] %v3364_v3  ;;  %3035 = vmatprep.subr.bf16.mxu0 %v3278_v6  ;;  %v3465_v16 = vld [vmem:[%s4104_s2] ss:$0 sm:$0xff]  ;;  %v280_v19 = vmul.f32 %v2883_v14, %v3457_v12  ;;  %v281_v21 = vmul.f32 %v2884_v15, %v3457_v12  ;;  %v2887_v22 = vunpack.c.l.bf16 %v2917_v20  ;;  %v2888_v29 = vunpack.c.h.bf16 %v2917_v20 }
  0x14   : > { %253 = vst [vmem:[#allocation2 + $0x40] sm:$0xf] %v3364_v3  ;;  %254 = vst [vmem:[#allocation2 + $0x44] sm:$0x1] %v3364_v3  ;;  %v3467_v17 = vld [vmem:[#allocation2] sm:$0xf] }
  0x15   : > { %255 = vst [vmem:[#allocation2 + $0x48] sm:$0xf] %v3364_v3  ;;  %256 = vst [vmem:[#allocation2 + $0x4c] sm:$0x1] %v3364_v3  ;;  %3060 = vmatpush3.bf16.msra.mxu1 %v3275_v4  ;;  %v3284_v18 = vld [vmem:[%s4105_s3 + $0x50] sm:$0xff]   ;;  %v3283_v23 = vld [vmem:[%s4105_s3 + $0x8] sm:$0xff]   ;;  %v295_v24 = vadd.f32 %v3465_v16, %v280_v19  ;;  %v296_v26 = vadd.f32 %v3465_v16, %v281_v21  ;;  %v282_v28 = vmul.f32 %v2887_v22, %v3457_v12 }
  0x16   : > { %3061 = vmatprep.subr.bf16.mxu1 %v3277_v7  ;;  %3036 = vmatpush3.bf16.msra.mxu0 %v3278_v6  ;;  %v514_v25 = vshrl.u32 %v3467_v17, 16  ;;  %v517_v27 = vshll.u32 %v3467_v17, 16  ;;  %v3286_v30 = vld [vmem:[%s4105_s3 + $0x48] sm:$0xff]   ;;  %vm425_vm1 = vsmask.f32 7938  ;;  %vm430_vm2 = vcmask 1040384  }
  0x17   : > { %3037 = vmatprep.subr.bf16.mxu0 %v3280_v8  ;;  %v303_v31 = vmax.f32 %v295_v24, 0.0  ;;  %v304_v32 = vmax.f32 %v296_v26, 0.0  ;;  %v297_v33 = vadd.f32 %v3465_v16, %v282_v28  ;;  %v3285_v34 = vld [vmem:[%s4105_s3] sm:$0xff]   ;;  %vm431_vm3 = vsmask.f32 256  ;;  %v3496_v43 = vld [vmem:[%s4105_s3 + $0xf8] sm:$0xff]   ;;  %vm3505_vm4 = vmand %vm424_vm0, %vm425_vm1 }
  0x18   : > { %v3490_v36 = vrot.slane %v514_v25, 4  ;;  %v519_v38 = vrot.slane %v517_v27, 5  ;;  %v283_v40 = vmul.f32 %v2888_v29, %v3457_v12  ;;  %v3290_v46 = vld [vmem:[%s4105_s3 + $0x40] sm:$0xff]   ;;  %v427_v47 = vld [vmem:[#allocation2 + $0x8] sm:$0xf]  ;;  %v3512_v55 = vld [vmem:[%s4105_s3 + $0xb8] sm:$0xff]  }
  0x19   : > { %3062 = vmatpush3.bf16.msra.mxu1 %v3277_v7  ;;  %v2873_v35 = vpack.c.bf16 %v303_v31, %v303_v31  ;;  %v2874_v37 = vpack.c.bf16 %v304_v32, %v304_v32  ;;  %v305_v39 = vmax.f32 %v297_v33, 0.0  ;;  %v436_v49 = vld [vmem:[#allocation2 + $0x10] sm:$0xf]  ;;  %v433_v50 = vld [vmem:[#allocation2 + $0xc] sm:$0x1]  ;;  %vm3516_vm5 = vmand %vm430_vm2, %vm431_vm3  ;;  %vm932_vm9 = vcmask 1042432  }
  0x1a   : > { %3063 = vmatprep.subr.bf16.mxu1 %v3279_v9  ;;  %3038 = vmatpush3.bf16.msra.mxu0 %v3280_v8  ;;  %v3501_v51 = vld [vmem:[#allocation2 + $0x4] sm:$0x1]  ;;  %v439_v59 = vld [vmem:[#allocation2 + $0x14] sm:$0x1]  ;;  %v298_v60 = vadd.f32 %v3465_v16, %v283_v40  ;;  %v442_v1 = vld [vmem:[#allocation2 + $0x18] sm:$0xf]  ;;  %v520_v3 = vor.u32 %v519_v38, %v3490_v36 }
  0x1b   : > { %3039 = vmatprep.subr.bf16.mxu0 %v3282_v10  ;;  %v344_v41 = vshrl.u32 %v2873_v35, 16  ;;  %v347_v42 = vshll.u32 %v2873_v35, 16  ;;  %v352_v44 = vshrl.u32 %v2874_v37, 16  ;;  %v355_v45 = vshll.u32 %v2874_v37, 16  ;;  %v3548_v26 = vld [vmem:[%s3448_s17 + $0x18] sm:$0xff]   ;;  %v3315_v53 = vld [vmem:[%s4105_s3 + $0x160] sm:$0xff]  }
  0x1c   : > { %v2875_v48 = vpack.c.bf16 %v305_v39, %v305_v39  ;;  %v523_v4 = vshll.u32 %v3501_v51, 16  ;;  %vm510_vm6 = vsmask.f32 3328  ;;  %vm511_vm7 = vsmask.f32 7440  ;;  %v3349_v24 = vld [vmem:[%s4105_s3 + $0x220] sm:$0xff]  }
  0x1d   : > { %3064 = vmatpush3.bf16.msra.mxu1 %v3279_v9  ;;  %v346_v52 = vrot.slane %v344_v41, 7  ;;  %v354_v54 = vrot.slane %v352_v44, 7  ;;  %v445_v9 = vld [vmem:[#allocation2 + $0x1c] sm:$0x1]  ;;  %v306_v14 = vmax.f32 %v298_v60, 0.0  ;;  %v3538_v21 = vrot.slane %v520_v3, 4  ;;  %vm3542_vm8 = vmor %vm510_vm6, %vm511_vm7 }
  0x1e   : > { %3065 = vmatprep.subr.bf16.mxu1 %v3281_v13  ;;  %3040 = vmatpush3.bf16.msra.mxu0 %v3282_v10  ;;  %v360_v56 = vshrl.u32 %v2875_v48, 16  ;;  %v363_v57 = vshll.u32 %v2875_v48, 16  ;;  %v3540_v22 = vrot.slane %v523_v4, 5  ;;  %v937_v28 = vrot.slane %v3501_v51, 5 }
  0x1f   : > { %3041 = vmatprep.subr.bf16.mxu0 %v3284_v18  ;;  %v349_v61 = vor.u32 %v347_v42, %v346_v52  ;;  %v350_v62 = vrot.slane %v346_v52, 4  ;;  %v357_v63 = vor.u32 %v355_v45, %v354_v54  ;;  %v358_v0 = vrot.slane %v354_v54, 4 }
  0x20   : > { %v362_v2 = vrot.slane %v360_v56, 7  ;;  %vm933_vm10 = vcmask 1046532  }
  0x21   : > { %3066 = vmatpush3.bf16.msra.mxu1 %v3281_v13  ;;  %v428_v5 = vsel %vm3505_vm4, %v349_v61, %v427_v47  ;;  %v437_v6 = vsel %vm3505_vm4, %v357_v63, %v436_v49  ;;  %v434_v7 = vsel %vm3516_vm5, %v350_v62, %v433_v50  ;;  %v440_v8 = vsel %vm3516_vm5, %v358_v0, %v439_v59  ;;  %v2918_v13 = vld [vmem:[%s3448_s17 + $0x10] sm:$0xff]   ;;  %vm3665_vm11 = vmor %vm932_vm9, %vm933_vm10  ;;  %s4080_s17 = scalar_lea.vmem %s4106_s4, %s2871_s10  ;;  %s2598_s10 = sshll.u32 %s4138_s19, 3 }
  0x22   : > { %3067 = vmatprep.subr.bf16.mxu1 %v3283_v23  ;;  %3042 = vmatpush3.bf16.msra.mxu0 %v3284_v18  ;;  %429 = vst [vmem:[#allocation2 + $0x8] sm:$0xf] %v428_v5  ;;  %v365_v10 = vor.u32 %v363_v57, %v362_v2  ;;  %v366_v11 = vrot.slane %v362_v2, 4  ;;  %438 = vst [vmem:[#allocation2 + $0x10] sm:$0xf] %v437_v6  ;;  %v2891_v19 = vunpack.c.l.bf16 %v2918_v13  ;;  %v2892_v20 = vunpack.c.h.bf16 %v2918_v13  ;;  %v3291_v57 = vld [vmem:[%s4105_s3 + $0xf0] sm:$0xff]   ;;  %s235_s23 = scalar_lea.vmem %s4107_s5, %s2598_s10 }
  0x23   : > { %3043 = vmatprep.subr.bf16.mxu0 %v3286_v30  ;;  %435 = vst [vmem:[#allocation2 + $0xc] sm:$0x1] %v434_v7  ;;  %441 = vst [vmem:[#allocation2 + $0x14] sm:$0x1] %v440_v8  ;;  %v3293_v2 = vld [vmem:[%s4105_s3 + $0xe8] sm:$0xff]  }
  0x24   : > { %v443_v15 = vsel %vm3505_vm4, %v365_v10, %v442_v1  ;;  %v446_v18 = vsel %vm3516_vm5, %v366_v11, %v445_v9  ;;  %v284_v25 = vmul.f32 %v2891_v19, %v3457_v12  ;;  %v285_v27 = vmul.f32 %v2892_v20, %v3457_v12  ;;  %v448_v5 = vld [vmem:[#allocation2 + $0x20] sm:$0xf] }
  0x25   : > { %3068 = vmatpush3.bf16.msra.mxu1 %v3283_v23  ;;  %444 = vst [vmem:[#allocation2 + $0x18] sm:$0xf] %v443_v15  ;;  %447 = vst [vmem:[#allocation2 + $0x1c] sm:$0x1] %v446_v18  ;;  %v2876_v23 = vpack.c.bf16 %v306_v14, %v306_v14 }
  0x26   : > { %3069 = vmatprep.subr.bf16.mxu1 %v3285_v34  ;;  %3044 = vmatpush3.bf16.msra.mxu0 %v3286_v30  ;;  %v2895_v30 = vunpack.c.l.bf16 %v3548_v26  ;;  %v299_v35 = vadd.f32 %v3465_v16, %v284_v25  ;;  %v300_v45 = vadd.f32 %v3465_v16, %v285_v27  ;;  %v3295_v25 = vld [vmem:[%s4105_s3 + $0xe0] sm:$0xff]  }
  0x27   : > { %3045 = vmatprep.subr.bf16.mxu0 %v3290_v46  ;;  %v368_v29 = vshrl.u32 %v2876_v23, 16  ;;  %v371_v63 = vshll.u32 %v2876_v23, 16 }
  0x28   : > { %v286_v50 = vmul.f32 %v2895_v30, %v3457_v12  ;;  %v307_v8 = vmax.f32 %v299_v35, 0.0  ;;  %v308_v14 = vmax.f32 %v300_v45, 0.0 }
  0x29   : > { %3070 = vmatpush3.bf16.msra.mxu1 %v3285_v34  ;;  %v479_v31 = vld [vmem:[#allocation2 + $0x8] sm:$0xf]  ;;  %v480_v32 = vld [vmem:[#allocation2 + $0x10] sm:$0xf]  ;;  %v526_v34 = vsel %vm3542_vm8, %v3538_v21, %v3540_v22  ;;  %v370_v9 = vrot.slane %v368_v29, 7 }
  0x2a   : > { %3103 = vmatprep.subr.bf16.mxu1 %v3496_v43  ;;  %3046 = vmatpush3.bf16.msra.mxu0 %v3290_v46  ;;  %v3553_v33 = vld [vmem:[#allocation2 + $0xc] sm:$0x1]  ;;  %v528_v36 = vshrl.u32 %v479_v31, 16  ;;  %v531_v37 = vshll.u32 %v479_v31, 16  ;;  %v2637_v38 = vcombine.low %v3467_v17, %v479_v31  ;;  %v542_v39 = vshrl.u32 %v480_v32, 16 }
  0x2b   : > { %3079 = vmatprep.subr.bf16.mxu0 %v3512_v55  ;;  %v3561_v40 = vld [vmem:[#allocation2 + $0x14] sm:$0x1]  ;;  %v545_v41 = vshll.u32 %v480_v32, 16  ;;  %v537_v42 = vshll.u32 %v3553_v33, 16  ;;  %v301_v13 = vadd.f32 %v3465_v16, %v286_v50  ;;  %v2877_v18 = vpack.c.bf16 %v307_v8, %v307_v8  ;;  %v451_v21 = vld [vmem:[#allocation2 + $0x24] sm:$0x1] }
  0x2c   : > { %v551_v44 = vshll.u32 %v3561_v40, 16  ;;  %v530_v46 = vrot.slane %v528_v36, 4  ;;  %v533_v47 = vrot.slane %v531_v37, 5  ;;  %3071 = vmatprep.mubr.bf16.mxu1 %v2637_v38  ;;  %v481_v48 = vld [vmem:[#allocation2 + $0x18] sm:$0xf]  ;;  %v544_v49 = vrot.slane %v542_v39, 4 }
  0x2d   : > { %v547_v52 = vrot.slane %v545_v41, 5  ;;  %v556_v54 = vshrl.u32 %v481_v48, 16  ;;  %v559_v17 = vshll.u32 %v481_v48, 16  ;;  %v2638_v56 = vcombine.low %v480_v32, %v481_v48  ;;  %v3570_v59 = vld [vmem:[#allocation2 + $0x1c] sm:$0x1]  ;;  %v3294_v38 = vld [vmem:[%s4105_s3 + $0xb0] sm:$0xff]  }
  0x2e   : > { %v534_v60 = vor.u32 %v533_v47, %v530_v46  ;;  %v539_v61 = vrot.slane %v537_v42, 5  ;;  %v565_v62 = vshll.u32 %v3570_v59, 16  ;;  %v553_v4 = vrot.slane %v551_v44, 5  ;;  %v454_v41 = vld [vmem:[#allocation2 + $0x28] sm:$0xf] }
  0x2f   : > { %v558_v0 = vrot.slane %v556_v54, 4  ;;  %v561_v1 = vrot.slane %v559_v17, 5  ;;  %3072 = vmatmul.mubr.bf16.vlgmr.msra.gmra.mxu1 %v2638_v56  ;;  %v548_v3 = vor.u32 %v547_v52, %v544_v49  ;;  %v373_v19 = vor.u32 %v371_v63, %v370_v9  ;;  %v460_v47 = vld [vmem:[#allocation2 + $0x30] sm:$0xf]  ;;  %v457_v48 = vld [vmem:[#allocation2 + $0x2c] sm:$0x1] }
  0x30   : > { %3104 = vmatpush3.bf16.msra.mxu1 %v3496_v43  ;;  %v535_v6 = vrot.slane %v534_v60, 4  ;;  %v567_v7 = vrot.slane %v565_v62, 5  ;;  %v374_v20 = vrot.slane %v370_v9, 4  ;;  %v309_v27 = vmax.f32 %v301_v13, 0.0  ;;  %v466_v17 = vld [vmem:[#allocation2 + $0x38] sm:$0xf] }
  0x31   : > { %3105 = vmatprep.subr.bf16.mxu1 %v3291_v57  ;;  %v549_v10 = vrot.slane %v548_v3, 4  ;;  %v562_v11 = vor.u32 %v561_v1, %v558_v0  ;;  %v376_v29 = vshrl.u32 %v2877_v18, 16  ;;  %v379_v30 = vshll.u32 %v2877_v18, 16  ;;  %v463_v56 = vld [vmem:[#allocation2 + $0x34] sm:$0x1] }
  0x32   : > { %v540_v15 = vsel %vm3542_vm8, %v535_v6, %v539_v61  ;;  %v449_v31 = vsel %vm3505_vm4, %v373_v19, %v448_v5  ;;  %v2878_v32 = vpack.c.bf16 %v308_v14, %v308_v14  ;;  %v2879_v35 = vpack.c.bf16 %v309_v27, %v309_v27  ;;  %v469_v61 = vld [vmem:[#allocation2 + $0x3c] sm:$0x1]  ;;  %v3610_v5 = vld [vmem:[#allocation2] sm:$0xe] }
  0x33   : > { %v2625_v22 = vcombine.low %v526_v34, %v540_v15  ;;  %v554_v43 = vsel %vm3542_vm8, %v549_v10, %v553_v4  ;;  %v563_v23 = vrot.slane %v562_v11, 4  ;;  %450 = vst [vmem:[#allocation2 + $0x20] sm:$0xf] %v449_v31  ;;  %v452_v36 = vsel %vm3516_vm5, %v374_v20, %v451_v21  ;;  %v3620_v11 = vld [vmem:[#allocation2 + $0x8] sm:$0xe]  ;;  %v3301_v27 = vld [vmem:[%s4105_s3 + $0x98] sm:$0xff]  }
  0x34   : > { %3106 = vmatpush3.bf16.msra.mxu1 %v3291_v57  ;;  %v378_v39 = vrot.slane %v376_v29, 7  ;;  %v384_v42 = vshrl.u32 %v2878_v32, 16  ;;  %v387_v44 = vshll.u32 %v2878_v32, 16  ;;  %453 = vst [vmem:[#allocation2 + $0x24] sm:$0x1] %v452_v36  ;;  %v392_v45 = vshrl.u32 %v2879_v35, 16 }
  0x35   : > { %3047 = vmatprep.mubr.bf16.mxu0 %v2625_v22  ;;  %3107 = vmatprep.subr.bf16.mxu1 %v3293_v2  ;;  %v568_v34 = vsel %vm3542_vm8, %v563_v23, %v567_v7  ;;  %v395_v46 = vshll.u32 %v2879_v35, 16  ;;  %v2896_v49 = vunpack.c.h.bf16 %v3548_v26  ;;  %v3297_v57 = vld [vmem:[%s4105_s3 + $0xd8] sm:$0xff]   ;;  %v3296_v26 = vld [vmem:[%s4105_s3 + $0xa8] sm:$0xff]   ;;  %v941_v1 = vrot.slane %v3553_v33, 5  ;;  %v3298_v7 = vld [vmem:[%s4105_s3 + $0xa0] sm:$0xff]  }
  0x36   : > { %v2626_v37 = vcombine.low %v554_v43, %v568_v34  ;;  %v381_v50 = vor.u32 %v379_v30, %v378_v39  ;;  %v382_v52 = vrot.slane %v378_v39, 4  ;;  %v386_v54 = vrot.slane %v384_v42, 7  ;;  %v3631_v23 = vld [vmem:[#allocation2 + $0x10] sm:$0xe]  ;;  %v3302_v29 = vld [vmem:[%s4105_s3 + $0xc8] sm:$0xff]  }
  0x37   : > { %v394_v60 = vrot.slane %v392_v45, 7  ;;  %v287_v6 = vmul.f32 %v2896_v49, %v3457_v12  ;;  %v945_v19 = vrot.slane %v3561_v40, 5  ;;  %v949_v21 = vrot.slane %v3570_v59, 5  ;;  %v3642_v34 = vld [vmem:[#allocation2 + $0x18] sm:$0xe] }
  0x38   : > { %3048 = vmatmul.mubr.bf16.vlgmr.msra.gmra.mxu0 %v2626_v37  ;;  %3108 = vmatpush3.bf16.msra.mxu1 %v3293_v2  ;;  %v455_v62 = vsel %vm3505_vm4, %v381_v50, %v454_v41  ;;  %v389_v63 = vor.u32 %v387_v44, %v386_v54  ;;  %v390_v0 = vrot.slane %v386_v54, 4  ;;  %v3299_v2 = vld [vmem:[%s4105_s3 + $0xd0] sm:$0xff]   ;;  %v2649_v30 = vrot.slane %v3610_v5, 9  ;;  %v3312_v40 = vld [vmem:[%s4105_s3 + $0x138] sm:$0xff]  }
  0x39   : > { %3080 = vmatpush3.bf16.msra.mxu0 %v3512_v55  ;;  %3109 = vmatprep.subr.bf16.mxu1 %v3295_v25  ;;  %v458_v55 = vsel %vm3516_vm5, %v382_v52, %v457_v48  ;;  %456 = vst [vmem:[#allocation2 + $0x28] sm:$0xf] %v455_v62  ;;  %v397_v3 = vor.u32 %v395_v46, %v394_v60  ;;  %v398_v4 = vrot.slane %v394_v60, 4  ;;  %v2650_v31 = vrot.slane %v3620_v11, 9  ;;  %v3304_v48 = vld [vmem:[%s4105_s3 + $0x90] sm:$0xff]   ;;  %v3305_v62 = vld [vmem:[%s4105_s3 + $0xc0] sm:$0xff]  }
  0x3a   : > { %3081 = vmatprep.subr.bf16.mxu0 %v3294_v38  ;;  %459 = vst [vmem:[#allocation2 + $0x2c] sm:$0x1] %v458_v55  ;;  %v482_v8 = vld [vmem:[#allocation2 + $0x20] sm:$0xf]  ;;  %v461_v9 = vsel %vm3505_vm4, %v389_v63, %v460_v47  ;;  %v464_v10 = vsel %vm3516_vm5, %v390_v0, %v463_v56  ;;  %v2651_v37 = vrot.slane %v3631_v23, 9  ;;  %v2652_v63 = vrot.slane %v3642_v34, 9 }
  0x3b   : > { %v570_v13 = vshrl.u32 %v482_v8, 16  ;;  %v573_v14 = vshll.u32 %v482_v8, 16  ;;  %462 = vst [vmem:[#allocation2 + $0x30] sm:$0xf] %v461_v9  ;;  %v467_v12 = vsel %vm3505_vm4, %v397_v3, %v466_v17  ;;  %v3624_v15 = vld [vmem:[#allocation2 + $0x24] sm:$0x1]  ;;  %v470_v18 = vsel %vm3516_vm5, %v398_v4, %v469_v61 }
  0x3c   : > { %3110 = vmatpush3.bf16.msra.mxu1 %v3295_v25  ;;  %465 = vst [vmem:[#allocation2 + $0x34] sm:$0x1] %v464_v10  ;;  %468 = vst [vmem:[#allocation2 + $0x38] sm:$0xf] %v467_v12  ;;  %v579_v20 = vshll.u32 %v3624_v15, 16  ;;  %v302_v25 = vadd.f32 %v3465_v16, %v287_v6  ;;  %v942_v51 = vsel %vm3665_vm11, %v2650_v31, %v941_v1 }
  0x3d   : > { %3082 = vmatpush3.bf16.msra.mxu0 %v3294_v38  ;;  %3111 = vmatprep.subr.bf16.mxu1 %v3297_v57  ;;  %471 = vst [vmem:[#allocation2 + $0x3c] sm:$0x1] %v470_v18  ;;  %v572_v22 = vrot.slane %v570_v13, 4  ;;  %v575_v43 = vrot.slane %v573_v14, 5  ;;  %v3307_v56 = vld [vmem:[#allocation2 + $0x8] ss:$8 sps:$4 sm:$0xff]  }
  0x3e   : > { %3083 = vmatprep.subr.bf16.mxu0 %v3296_v26  ;;  %v581_v36 = vrot.slane %v579_v20, 5  ;;  %v310_v42 = vmax.f32 %v302_v25, 0.0  ;;  %v3659_v4 = vld [vmem:[#allocation2 + $0x20] sm:$0xe]  ;;  %v3306_v18 = vld [vmem:[%s4105_s3 + $0x88] sm:$0xff]  }
  0x3f   : > { %v576_v32 = vor.u32 %v575_v43, %v572_v22  ;;  %v472_v31 = vld [vmem:[#allocation2 + $0x40] sm:$0xf] }
  0x40   : > { %3112 = vmatpush3.bf16.msra.mxu1 %v3297_v57  ;;  %v483_v16 = vld [vmem:[#allocation2 + $0x28] sm:$0xf]  ;;  %v2880_v22 = vpack.c.bf16 %v310_v42, %v310_v42 }
  0x41   : > { %3084 = vmatpush3.bf16.msra.mxu0 %v3296_v26  ;;  %3113 = vmatprep.subr.bf16.mxu1 %v3299_v2  ;;  %v3644_v35 = vld [vmem:[#allocation2 + $0x2c] sm:$0x1]  ;;  %v584_v38 = vshrl.u32 %v483_v16, 16  ;;  %v587_v39 = vshll.u32 %v483_v16, 16  ;;  %v2639_v41 = vcombine.low %v482_v8, %v483_v16  ;;  %v577_v45 = vrot.slane %v576_v32, 4 }
  0x42   : > { %3085 = vmatprep.subr.bf16.mxu0 %v3298_v7  ;;  %v484_v44 = vld [vmem:[#allocation2 + $0x30] sm:$0xf]  ;;  %v593_v46 = vshll.u32 %v3644_v35, 16  ;;  %v913_v20 = vld [vmem:[#allocation2 + $0x28] sm:$0xe]  ;;  %v953_v16 = vrot.slane %v3624_v15, 5 }
  0x43   : > { %v3648_v47 = vld [vmem:[#allocation2 + $0x34] sm:$0x1]  ;;  %v586_v49 = vrot.slane %v584_v38, 4  ;;  %v589_v50 = vrot.slane %v587_v39, 5  ;;  %3075 = vmatprep.mubr.bf16.mxu1 %v2639_v41  ;;  %v485_v52 = vld [vmem:[#allocation2 + $0x38] sm:$0xf]  ;;  %v582_v13 = vsel %vm3542_vm8, %v577_v45, %v581_v36  ;;  %v938_v39 = vsel %vm3665_vm11, %v2649_v30, %v937_v28 }
  0x44   : > { %3114 = vmatpush3.bf16.msra.mxu1 %v3299_v2  ;;  %v598_v54 = vshrl.u32 %v484_v44, 16  ;;  %v601_v17 = vshll.u32 %v484_v44, 16  ;;  %v612_v57 = vshrl.u32 %v485_v52, 16  ;;  %v615_v60 = vshll.u32 %v485_v52, 16  ;;  %v3653_v26 = vld [vmem:[#allocation2 + $0x3c] sm:$0x1] }
  0x45   : > { %3086 = vmatpush3.bf16.msra.mxu0 %v3298_v7  ;;  %3115 = vmatprep.subr.bf16.mxu1 %v3302_v29  ;;  %v2640_v61 = vcombine.low %v484_v44, %v485_v52  ;;  %v590_v2 = vor.u32 %v589_v50, %v586_v49  ;;  %v595_v3 = vrot.slane %v593_v46, 5  ;;  %v607_v8 = vshll.u32 %v3648_v47, 16  ;;  %v3311_v15 = vld [vmem:[%s4105_s3 + $0x170] sm:$0xff]   ;;  %v3310_v28 = vld [vmem:[%s4105_s3 + $0x80] sm:$0xff]   ;;  %v915_v11 = vld [vmem:[#allocation2 + $0x38] sm:$0xe] }
  0x46   : > { %3087 = vmatprep.subr.bf16.mxu0 %v3301_v27  ;;  %v600_v0 = vrot.slane %v598_v54, 4  ;;  %v603_v55 = vrot.slane %v601_v17, 5  ;;  %v614_v6 = vrot.slane %v612_v57, 4  ;;  %v617_v7 = vrot.slane %v615_v60, 5  ;;  %v914_v30 = vld [vmem:[#allocation2 + $0x30] sm:$0xe] }
  0x47   : > { %3076 = vmatmul.mubr.bf16.gmra.mxu1 %v2640_v61  ;;  %v621_v9 = vshll.u32 %v3653_v26, 16  ;;  %v591_v14 = vrot.slane %v590_v2, 4  ;;  %v609_v43 = vrot.slane %v607_v8, 5  ;;  %v2653_v41 = vrot.slane %v3659_v4, 9  ;;  %v3318_v1 = vld [vmem:[#allocation2 + $0x28] ss:$8 sps:$4 sm:$0xff]  }
  0x48   : > { %3116 = vmatpush3.bf16.msra.mxu1 %v3302_v29  ;;  %v604_v12 = vor.u32 %v603_v55, %v600_v0  ;;  %v618_v25 = vor.u32 %v617_v7, %v614_v6  ;;  %v3309_v29 = vld [vmem:[#allocation2 + $0x18] ss:$8 sps:$4 sm:$0xff]   ;;  %3119 = vmatprep.mubr.bf16.mxu1 %v3307_v56  ;;  %v2654_v45 = vrot.slane %v913_v20, 9  ;;  %v400_v46 = vshrl.u32 %v2880_v22, 16  ;;  %v3313_v17 = vld [vmem:[%s4105_s3 + $0x168] sm:$0xff]  }
  0x49   : > { %3088 = vmatpush3.bf16.msra.mxu0 %v3301_v27  ;;  %v623_v32 = vrot.slane %v621_v9, 5  ;;  %3117 = vmatprep.subr.bf16.mxu1 %v3305_v62  ;;  %v3308_v27 = vld [vmem:[%s4105_s3 + $0x178] sm:$0xff]   ;;  %v596_v36 = vsel %vm3542_vm8, %v591_v14, %v595_v3  ;;  %v403_v49 = vshll.u32 %v2880_v22, 16  ;;  %v2673_v52 = vcombine.low %v938_v39, %v942_v51  ;;  %v1292_v61 = vld [vmem:[#allocation2 + $0xc] sm:$0x1] }
  0x4a   : > { %3089 = vmatprep.subr.bf16.mxu0 %v3304_v48  ;;  %v605_v38 = vrot.slane %v604_v12, 4  ;;  %v2627_v42 = vcombine.low %v582_v13, %v596_v36  ;;  %v619_v44 = vrot.slane %v618_v25, 4  ;;  %v3704_v54 = vrot.slane %v400_v46, 7  ;;  %v1573_v0 = vld [vmem:[#allocation2 + $0x8] sm:$0xe]  ;;  %v3317_v25 = vld [vmem:[%s4105_s3 + $0x158] sm:$0xff]  }
  0x4b   : > { %v2655_v56 = vrot.slane %v914_v30, 9  ;;  %v950_v60 = vsel %vm3665_vm11, %v2652_v63, %v949_v21  ;;  %v961_v23 = vrot.slane %v3648_v47, 5  ;;  %v965_v59 = vrot.slane %v3653_v26, 5  ;;  %v3314_v26 = vld [vmem:[%s4105_s3 + $0x130] sm:$0xff]   ;;  %v1291_v13 = vld [vmem:[#allocation2 + $0x8] sm:$0xf] }
  0x4c   : > { %v610_v5 = vsel %vm3542_vm8, %v605_v38, %v609_v43  ;;  %3118 = vmatpush3.bf16.msra.mxu1 %v3305_v62  ;;  %3051 = vmatprep.mubr.bf16.mxu0 %v2627_v42  ;;  %v624_v33 = vsel %vm3542_vm8, %v619_v44, %v623_v32  ;;  %v405_v57 = vor.u32 %v403_v49, %v3704_v54  ;;  %v3722_v62 = vld [vmem:[#allocation2 + $0x14] sm:$0x1]  ;;  %v2741_v55 = vrot.slane %v1573_v0, 9  ;;  %v3316_v14 = vld [vmem:[%s4105_s3 + $0x128] sm:$0xff]   ;;  %v1297_v51 = vld [vmem:[#allocation2 + $0x20] sm:$0xf] }
  0x4d   : > { %3090 = vmatpush3.bf16.msra.mxu0 %v3304_v48  ;;  %v2628_v50 = vcombine.low %v610_v5, %v624_v33  ;;  %3151 = vmatprep.subr.bf16.mxu1 %v3308_v27  ;;  %v957_v48 = vrot.slane %v3644_v35, 5  ;;  %v946_v35 = vsel %vm3665_vm11, %v2651_v37, %v945_v19  ;;  %v2656_v19 = vrot.slane %v915_v11, 9  ;;  %v1574_v37 = vld [vmem:[#allocation2 + $0x10] sm:$0xe]  ;;  %v3320_v5 = vld [vmem:[%s4105_s3 + $0x120] sm:$0xff]  }
  0x4e   : > { %3091 = vmatprep.subr.bf16.mxu0 %v3306_v18  ;;  %v473_v34 = vsel %vm3505_vm4, %v405_v57, %v472_v31  ;;  %v954_v21 = vsel %vm3665_vm11, %v2653_v41, %v953_v16  ;;  %v1599_v2 = vrot.slane %v1292_v61, 5  ;;  %v2674_v3 = vcombine.low %v946_v35, %v950_v60  ;;  %v1295_v16 = vld [vmem:[#allocation2 + $0x18] sm:$0xf]  ;;  %v3762_v30 = vld [vmem:[#allocation2 + $0x24] sm:$0x1] }
  0x4f   : > { %3120 = vmatmul.mubr.bf16.vlgmr.msra.gmra.mxu1 %v3309_v29  ;;  %3052 = vmatmul.mubr.bf16.gmra.mxu0 %v2628_v50  ;;  %v958_v63 = vsel %vm3665_vm11, %v2654_v45, %v957_v48  ;;  %474 = vst [vmem:[#allocation2 + $0x40] sm:$0xf] %v473_v34  ;;  %v2742_v47 = vrot.slane %v1574_v37, 9  ;;  %v1603_v4 = vrot.slane %v3722_v62, 5  ;;  %v962_v7 = vsel %vm3665_vm11, %v2655_v56, %v961_v23  ;;  %v3767_v31 = vld [vmem:[#allocation2 + $0x18] sm:$0xe] }
  0x50   : > { %3152 = vmatpush3.bf16.msra.mxu1 %v3308_v27  ;;  %3095 = vmatprep.mubr.bf16.mxu0 %v2673_v52  ;;  %v2675_v6 = vcombine.low %v954_v21, %v958_v63  ;;  %v966_v8 = vsel %vm3665_vm11, %v2656_v19, %v965_v59  ;;  %v1600_v9 = vsel %vm3665_vm11, %v2741_v55, %v1599_v2  ;;  %v1308_v20 = vshrl.u32 %v1291_v13, 16  ;;  %v1299_v63 = vld [vmem:[#allocation2 + $0x28] sm:$0xf]  ;;  %v3782_v55 = vld [vmem:[#allocation2 + $0x2c] sm:$0x1] }
  0x51   : > { %3092 = vmatpush3.bf16.msra.mxu0 %v3306_v18  ;;  %3153 = vmatprep.subr.bf16.mxu1 %v3311_v15  ;;  %v1604_v12 = vsel %vm3665_vm11, %v2742_v47, %v1603_v4  ;;  %v1293_v18 = vld [vmem:[#allocation2 + $0x10] sm:$0xf]  ;;  %v1311_v22 = vshll.u32 %v1291_v13, 16  ;;  %v1317_v43 = vshll.u32 %v1292_v61, 16  ;;  %v1331_v29 = vshll.u32 %v3722_v62, 16  ;;  %v3323_v61 = vld [vmem:[%s4105_s3 + $0x148] sm:$0xff]  }
  0x52   : > { %3093 = vmatprep.subr.bf16.mxu0 %v3310_v28  ;;  %3123 = vmatprep.mubr.bf16.mxu1 %v3318_v1  ;;  %v1322_v32 = vshrl.u32 %v1293_v18, 16  ;;  %v1325_v27 = vshll.u32 %v1293_v18, 16  ;;  %v2676_v36 = vcombine.low %v962_v7, %v966_v8  ;;  %v1310_v39 = vrot.slane %v1308_v20, 4  ;;  %v3321_v1 = vld [vmem:[%s4105_s3 + $0x150] sm:$0xff]   ;;  %v1576_v62 = vld [vmem:[#allocation2 + $0x20] sm:$0xe] }
  0x53   : > { %v1313_v41 = vrot.slane %v1311_v22, 5  ;;  %v2765_v42 = vcombine.low %v1600_v9, %v1604_v12  ;;  %v1336_v45 = vshrl.u32 %v1295_v16, 16  ;;  %v1319_v49 = vrot.slane %v1317_v43, 5  ;;  %v1301_v47 = vld [vmem:[#allocation2 + $0x30] sm:$0xf]  ;;  %v3325_v43 = vld [vmem:[%s4105_s3 + $0x140] sm:$0xff]  }
  0x54   : > { %3154 = vmatpush3.bf16.msra.mxu1 %v3311_v15  ;;  %v1324_v44 = vrot.slane %v1322_v32, 4  ;;  %v1327_v15 = vrot.slane %v1325_v27, 5  ;;  %v1339_v33 = vshll.u32 %v1295_v16, 16  ;;  %v1350_v11 = vshrl.u32 %v1297_v51, 16  ;;  %v3785_v4 = vld [vmem:[#allocation2 + $0x34] sm:$0x1] }
  0x55   : > { %3094 = vmatpush3.bf16.msra.mxu0 %v3310_v28  ;;  %3155 = vmatprep.subr.bf16.mxu1 %v3313_v17  ;;  %v3760_v28 = vld [vmem:[#allocation2 + $0x1c] sm:$0x1]  ;;  %v1314_v46 = vor.u32 %v1313_v41, %v1310_v39  ;;  %v1333_v52 = vrot.slane %v1331_v29, 5  ;;  %v1338_v48 = vrot.slane %v1336_v45, 4  ;;  %v406_v56 = vrot.slane %v3704_v54, 4  ;;  %v3324_v22 = vld [vmem:[%s4105_s3 + $0x110] sm:$0xff]  }
  0x56   : > { %3127 = vmatprep.subr.bf16.mxu0 %v3312_v40  ;;  %v3319_v38 = vld [vmem:[#allocation2 + $0x38] ss:$8 sps:$4 sm:$0xff]   ;;  %v1328_v50 = vor.u32 %v1327_v15, %v1324_v44  ;;  %v1341_v35 = vrot.slane %v1339_v33, 5  ;;  %v1352_v60 = vrot.slane %v1350_v11, 4  ;;  %v1359_v19 = vshll.u32 %v3762_v30, 16 }
  0x57   : > { %3124 = vmatmul.mubr.bf16.gmra.mxu1 %v3319_v38  ;;  %v1315_v57 = vrot.slane %v1314_v46, 4  ;;  %v3322_v54 = vld [vmem:[%s4105_s3 + $0x118] sm:$0xff]   ;;  %v2743_v2 = vrot.slane %v3767_v31, 9  ;;  %v1367_v7 = vshll.u32 %v1299_v63, 16  ;;  %v1378_v8 = vshrl.u32 %v1301_v47, 16  ;;  %v3326_v31 = vld [vmem:[%s4105_s3 + $0x108] sm:$0xff]  }
  0x58   : > { %3096 = vmatmul.mubr.bf16.vlgmr.msra.gmra.mxu0 %v2674_v3  ;;  %3156 = vmatpush3.bf16.msra.mxu1 %v3313_v17  ;;  %v1353_v17 = vshll.u32 %v1297_v51, 16  ;;  %v1329_v0 = vrot.slane %v1328_v50, 4  ;;  %v1342_v37 = vor.u32 %v1341_v35, %v1338_v48  ;;  %v475_v9 = vld [vmem:[#allocation2 + $0x44] sm:$0x1]  ;;  %v2744_v13 = vrot.slane %v1576_v62, 9  ;;  %v3327_v41 = vld [vmem:[%s4105_s3 + $0x1f8] sm:$0xff]  }
  0x59   : > { %3128 = vmatpush3.bf16.msra.mxu0 %v3312_v40  ;;  %3157 = vmatprep.subr.bf16.mxu1 %v3315_v53  ;;  %v1345_v40 = vshll.u32 %v3760_v28, 16  ;;  %v1320_v59 = vsel %vm3542_vm8, %v1315_v57, %v1319_v49  ;;  %v3791_v12 = vrot.slane %v1359_v19, 5  ;;  %v1381_v18 = vshll.u32 %v1301_v47, 16  ;;  %v1303_v20 = vld [vmem:[#allocation2 + $0x38] sm:$0xf]  ;;  %v3329_v35 = vld [vmem:[%s4105_s3 + $0x1f0] sm:$0xff]  }
  0x5a   : > { %3129 = vmatprep.subr.bf16.mxu0 %v3314_v26  ;;  %3099 = vmatprep.mubr.bf16.mxu0 %v2675_v6  ;;  %v1355_v23 = vrot.slane %v1353_v17, 5  ;;  %v1334_v34 = vsel %vm3542_vm8, %v1329_v0, %v1333_v52  ;;  %v1611_v6 = vrot.slane %v3762_v30, 5  ;;  %v1373_v27 = vshll.u32 %v3782_v55, 16  ;;  %v1305_v39 = vld [vmem:[#allocation2 + $0x40] sm:$0xf] }
  0x5b   : > { %3167 = vmatprep.mubr.bf16.mxu1 %v2765_v42  ;;  %v2729_v3 = vcombine.low %v1320_v59, %v1334_v34  ;;  %v1387_v29 = vshll.u32 %v3785_v4, 16  ;;  %v476_v38 = vsel %vm3516_vm5, %v406_v56, %v475_v9  ;;  %v1380_v42 = vrot.slane %v1378_v8, 4  ;;  %v1578_v17 = vld [vmem:[#allocation2 + $0x30] sm:$0xe]  ;;  %v1579_v0 = vld [vmem:[#allocation2 + $0x38] sm:$0xe] }
  0x5c   : > { %3158 = vmatpush3.bf16.msra.mxu1 %v3315_v53  ;;  %v1356_v21 = vor.u32 %v1355_v23, %v1352_v60  ;;  %v1364_v53 = vshrl.u32 %v1299_v63, 16  ;;  %v1383_v44 = vrot.slane %v1381_v18, 5  ;;  %477 = vst [vmem:[#allocation2 + $0x44] sm:$0x1] %v476_v38  ;;  %v1392_v15 = vshrl.u32 %v1303_v20, 16  ;;  %v3328_v23 = vld [vmem:[%s4105_s3 + $0x100] sm:$0xff]  }
  0x5d   : > { %3130 = vmatpush3.bf16.msra.mxu0 %v3314_v26  ;;  %3159 = vmatprep.subr.bf16.mxu1 %v3317_v25  ;;  %v1607_v26 = vrot.slane %v3760_v28, 5  ;;  %v1395_v51 = vshll.u32 %v1303_v20, 16  ;;  %v1304_v28 = vld [vmem:[#allocation2 + $0x3c] sm:$0x1]  ;;  %v1406_v58 = vshrl.u32 %v1305_v39, 16  ;;  %v1409_v30 = vshll.u32 %v1305_v39, 16 }
  0x5e   : > { %3131 = vmatprep.subr.bf16.mxu0 %v3316_v14  ;;  %v3801_v32 = vrot.slane %v1356_v21, 4  ;;  %v1366_v16 = vrot.slane %v1364_v53, 4  ;;  %v3814_v46 = vrot.slane %v1373_v27, 5  ;;  %v3816_v49 = vrot.slane %v1387_v29, 5  ;;  %v1956_v39 = vld [vmem:[#allocation2 + $0x18] sm:$0xf] }
  0x5f   : > { %v1608_v45 = vsel %vm3665_vm11, %v2743_v2, %v1607_v26  ;;  %v1394_v33 = vrot.slane %v1392_v15, 4  ;;  %v1397_v11 = vrot.slane %v1395_v51, 5  ;;  %v1408_v52 = vrot.slane %v1406_v58, 4 }
  0x60   : > { %3100 = vmatmul.mubr.bf16.gmra.mxu0 %v2676_v36  ;;  %3160 = vmatpush3.bf16.msra.mxu1 %v3317_v25  ;;  %v3799_v25 = vrot.slane %v1342_v37, 4  ;;  %v1369_v36 = vrot.slane %v1367_v7, 5  ;;  %v1411_v48 = vrot.slane %v1409_v30, 5  ;;  %v1384_v60 = vor.u32 %v1383_v44, %v1380_v42  ;;  %v3331_v7 = vld [vmem:[%s4105_s3 + $0x1e8] sm:$0xff]  }
  0x61   : > { %3132 = vmatpush3.bf16.msra.mxu0 %v3316_v14  ;;  %3161 = vmatprep.subr.bf16.mxu1 %v3321_v1  ;;  %v3789_v14 = vrot.slane %v1345_v40, 5  ;;  %v2746_v62 = vrot.slane %v1578_v17, 9  ;;  %v1580_v40 = vld [vmem:[#allocation2 + $0x40] sm:$0xe]  ;;  %v1619_v19 = vrot.slane %v3785_v4, 5  ;;  %v1398_v59 = vor.u32 %v1397_v11, %v1394_v33 }
  0x62   : > { %3133 = vmatprep.subr.bf16.mxu0 %v3320_v5  ;;  %3143 = vmatprep.mubr.bf16.mxu0 %v2729_v3  ;;  %v1370_v50 = vor.u32 %v1369_v36, %v1366_v16  ;;  %v1401_v34 = vshll.u32 %v1304_v28, 16  ;;  %v1623_v21 = vrot.slane %v1304_v28, 5  ;;  %v2748_v3 = vrot.slane %v1580_v40, 9  ;;  %v1954_v16 = vld [vmem:[#allocation2 + $0x10] sm:$0xf] }
  0x63   : > { %v1620_v2 = vsel %vm3665_vm11, %v2746_v62, %v1619_v19  ;;  %v1385_v47 = vrot.slane %v1384_v60, 4  ;;  %v1412_v53 = vor.u32 %v1411_v48, %v1408_v52  ;;  %v1362_v18 = vsel %vm3542_vm8, %v3801_v32, %v3791_v12  ;;  %v3860_v36 = vld [vmem:[#allocation2 + $0x14] sm:$0x1]  ;;  %v3874_v17 = vld [vmem:[#allocation2 + $0x24] sm:$0x1] }
  0x64   : > { %3162 = vmatpush3.bf16.msra.mxu1 %v3321_v1  ;;  %v1577_v1 = vld [vmem:[#allocation2 + $0x28] sm:$0xe]  ;;  %v1371_v63 = vrot.slane %v1370_v50, 4  ;;  %v1399_v20 = vrot.slane %v1398_v59, 4  ;;  %v1971_v42 = vshrl.u32 %v1954_v16, 16  ;;  %v1974_v44 = vshll.u32 %v1954_v16, 16 }
  0x65   : > { %3134 = vmatpush3.bf16.msra.mxu0 %v3320_v5  ;;  %3163 = vmatprep.subr.bf16.mxu1 %v3323_v61  ;;  %v1612_v5 = vsel %vm3665_vm11, %v2744_v13, %v1611_v6  ;;  %v2745_v56 = vrot.slane %v1577_v1, 9  ;;  %v3330_v6 = vld [vmem:[%s4105_s3 + $0x1b8] sm:$0xff]   ;;  %v1348_v13 = vsel %vm3542_vm8, %v3799_v25, %v3789_v14  ;;  %v3333_v14 = vld [vmem:[%s4105_s3 + $0x1e0] sm:$0xff]   ;;  %v1390_v25 = vsel %vm3542_vm8, %v1385_v47, %v3816_v49  ;;  %v3332_v28 = vld [vmem:[%s4105_s3 + $0x1b0] sm:$0xff]  }
  0x66   : > { %3135 = vmatprep.subr.bf16.mxu0 %v3322_v54  ;;  %v2766_v57 = vcombine.low %v1608_v45, %v1612_v5  ;;  %v1413_v12 = vrot.slane %v1412_v53, 4  ;;  %v2730_v38 = vcombine.low %v1348_v13, %v1362_v18  ;;  %v1980_v15 = vshll.u32 %v3860_v36, 16  ;;  %v3335_v49 = vld [vmem:[%s4105_s3 + $0x1d8] sm:$0xff]   ;;  %v1958_v1 = vld [vmem:[#allocation2 + $0x20] sm:$0xf]  ;;  %v3339_v13 = vld [vmem:[%s4105_s3 + $0x1c8] sm:$0xff]  }
  0x67   : > { %v1985_v51 = vshrl.u32 %v1956_v39, 16  ;;  %v1988_v45 = vshll.u32 %v1956_v39, 16  ;;  %v1973_v30 = vrot.slane %v1971_v42, 4  ;;  %v3878_v60 = vld [vmem:[#allocation2 + $0x2c] sm:$0x1]  ;;  %v2002_v62 = vshll.u32 %v1958_v1, 16 }
  0x68   : > { %3164 = vmatpush3.bf16.msra.mxu1 %v3323_v61  ;;  %v1615_v61 = vrot.slane %v3782_v55, 5  ;;  %v1306_v55 = vld [vmem:[#allocation2 + $0x44] sm:$0x1]  ;;  %v1982_v52 = vrot.slane %v1980_v15, 5  ;;  %v2008_v47 = vshll.u32 %v3874_v17, 16  ;;  %v2022_v53 = vshll.u32 %v3878_v60, 16 }
  0x69   : > { %3136 = vmatpush3.bf16.msra.mxu0 %v3322_v54  ;;  %3165 = vmatprep.subr.bf16.mxu1 %v3325_v43  ;;  %v2747_v54 = vrot.slane %v1579_v0, 9  ;;  %v1415_v4 = vshll.u32 %v1306_v55, 16  ;;  %v1627_v9 = vrot.slane %v1306_v55, 5  ;;  %v1987_v33 = vrot.slane %v1985_v51, 4  ;;  %v3334_v0 = vld [vmem:[%s4105_s3 + $0x1a8] sm:$0xff]  }
  0x6a   : > { %3137 = vmatprep.subr.bf16.mxu0 %v3324_v22  ;;  %v1616_v37 = vsel %vm3665_vm11, %v2745_v56, %v1615_v61  ;;  %v1990_v11 = vrot.slane %v1988_v45, 5  ;;  %v1960_v56 = vld [vmem:[#allocation2 + $0x28] sm:$0xf]  ;;  %v1999_v61 = vshrl.u32 %v1958_v1, 16  ;;  %v2010_v18 = vrot.slane %v2008_v47, 5 }
  0x6b   : > { %v2767_v26 = vcombine.low %v1616_v37, %v1620_v2  ;;  %v1624_v8 = vsel %vm3665_vm11, %v2747_v54, %v1623_v21  ;;  %v1628_v27 = vsel %vm3665_vm11, %v2748_v3, %v1627_v9  ;;  %v1417_v32 = vrot.slane %v1415_v4, 5  ;;  %v3337_v21 = vld [vmem:[%s4105_s3 + $0x1d0] sm:$0xff]   ;;  %v3336_v4 = vld [vmem:[%s4105_s3 + $0x1a0] sm:$0xff]   ;;  %v3338_v9 = vld [vmem:[%s4105_s3 + $0x198] sm:$0xff]  }
  0x6c   : > { %3166 = vmatpush3.bf16.msra.mxu1 %v3325_v43  ;;  %v1376_v43 = vsel %vm3542_vm8, %v1371_v63, %v3814_v46  ;;  %v2768_v29 = vcombine.low %v1624_v8, %v1628_v27  ;;  %v1976_v46 = vrot.slane %v1974_v44, 5  ;;  %v2016_v19 = vshll.u32 %v1960_v56, 16  ;;  %v3346_v8 = vld [vmem:[#allocation2 + $0x10] ss:$8 sps:$4 sm:$0xff]   ;;  %v3341_v27 = vld [vmem:[%s4105_s3 + $0x1c0] sm:$0xff]  }
  0x6d   : > { %3138 = vmatpush3.bf16.msra.mxu0 %v3324_v22  ;;  %3199 = vmatprep.subr.bf16.mxu1 %v3327_v41  ;;  %v1403_v22 = vrot.slane %v1401_v34, 5  ;;  %v2731_v58 = vcombine.low %v1376_v43, %v1390_v25  ;;  %v2001_v59 = vrot.slane %v1999_v61, 4  ;;  %v2004_v34 = vrot.slane %v2002_v62, 5  ;;  %v3340_v25 = vld [vmem:[%s4105_s3 + $0x190] sm:$0xff]   ;;  %v1966_v44 = vld [vmem:[#allocation2 + $0x40] sm:$0xf] }
  0x6e   : > { %3139 = vmatprep.subr.bf16.mxu0 %v3326_v31  ;;  %v1977_v50 = vor.u32 %v1976_v46, %v1973_v30  ;;  %v2018_v2 = vrot.slane %v2016_v19, 5  ;;  %v3342_v62 = vld [vmem:[%s4105_s3 + $0x188] sm:$0xff]  }
  0x6f   : > { %3168 = vmatmul.mubr.bf16.vlgmr.msra.gmra.mxu1 %v2766_v57  ;;  %v1418_v57 = vsel %vm3542_vm8, %v1413_v12, %v1417_v32  ;;  %v3907_v12 = vld [vmem:[#allocation2 + $0x34] sm:$0x1]  ;;  %v1964_v32 = vld [vmem:[#allocation2 + $0x38] sm:$0xf] }
  0x70   : > { %3200 = vmatpush3.bf16.msra.mxu1 %v3327_v41  ;;  %3171 = vmatprep.mubr.bf16.mxu1 %v2767_v26  ;;  %v3862_v41 = vld [vmem:[#allocation2 + $0x1c] sm:$0x1]  ;;  %v1978_v40 = vrot.slane %v1977_v50, 4  ;;  %v2036_v39 = vshll.u32 %v3907_v12, 16  ;;  %v2041_v42 = vshrl.u32 %v1964_v32, 16  ;;  %v2044_v45 = vshll.u32 %v1964_v32, 16 }
  0x71   : > { %3140 = vmatpush3.bf16.msra.mxu0 %v3326_v31  ;;  %3201 = vmatprep.subr.bf16.mxu1 %v3329_v35  ;;  %v1994_v5 = vshll.u32 %v3862_v41, 16  ;;  %v1404_v31 = vsel %vm3542_vm8, %v1399_v20, %v1403_v22  ;;  %v2024_v20 = vrot.slane %v2022_v53, 5  ;;  %v2055_v50 = vshrl.u32 %v1966_v44, 16  ;;  %v2236_v32 = vld [vmem:[#allocation2 + $0x10] sm:$0xe] }
  0x72   : > { %3141 = vmatprep.subr.bf16.mxu0 %v3328_v23  ;;  %v2732_v37 = vcombine.low %v1404_v31, %v1418_v57  ;;  %v1983_v63 = vsel %vm3542_vm8, %v1978_v40, %v1982_v52  ;;  %v2046_v1 = vrot.slane %v2044_v45, 5  ;;  %v2058_v52 = vshll.u32 %v1966_v44, 16 }
  0x73   : > { %v1996_v48 = vrot.slane %v1994_v5, 5  ;;  %v2057_v40 = vrot.slane %v2055_v50, 4  ;;  %v2833_v44 = vrot.slane %v2236_v32, 9 }
  0x74   : > { %3202 = vmatpush3.bf16.msra.mxu1 %v3329_v35  ;;  %v1991_v35 = vor.u32 %v1990_v11, %v1987_v33  ;;  %v2043_v33 = vrot.slane %v2041_v42, 4  ;;  %v3919_v11 = vld [vmem:[#allocation2 + $0x4c] sm:$0x1]  ;;  %v3350_v42 = vld [vmem:[#allocation2 + $0x30] ss:$8 sps:$4 sm:$0xff]  }
  0x75   : > { %3142 = vmatpush3.bf16.msra.mxu0 %v3328_v23  ;;  %3203 = vmatprep.subr.bf16.mxu1 %v3331_v7  ;;  %v2013_v23 = vshrl.u32 %v1960_v56, 16  ;;  %v2078_v19 = vshll.u32 %v3919_v11, 16 }
  0x76   : > { %3175 = vmatprep.subr.bf16.mxu0 %v3330_v6  ;;  %v1992_v54 = vrot.slane %v1991_v35, 4 }
  0x77   : > { %3172 = vmatmul.mubr.bf16.gmra.mxu1 %v2768_v29  ;;  %v2015_v55 = vrot.slane %v2013_v23, 4  ;;  %v3909_v29 = vld [vmem:[#allocation2 + $0x3c] sm:$0x1]  ;;  %v2060_v23 = vrot.slane %v2058_v52, 5  ;;  %v2080_v53 = vrot.slane %v2078_v19, 5  ;;  %v2290_v52 = vrot.slane %v3919_v11, 5 }
  0x78   : > { %3144 = vmatmul.mubr.bf16.vlgmr.msra.gmra.mxu0 %v2730_v38  ;;  %3204 = vmatpush3.bf16.msra.mxu1 %v3331_v7  ;;  %v1997_v3 = vsel %vm3542_vm8, %v1992_v54, %v1996_v48  ;;  %v2050_v5 = vshll.u32 %v3909_v29, 16  ;;  %v3924_v48 = vld [vmem:[%s4105_s3 + $0x238] sm:$0xff]   ;;  %v2239_v11 = vld [vmem:[#allocation2 + $0x28] sm:$0xe]  ;;  %v2274_v19 = vrot.slane %v3878_v60, 5 }
  0x79   : > { %3176 = vmatpush3.bf16.msra.mxu0 %v3330_v6  ;;  %3205 = vmatprep.subr.bf16.mxu1 %v3333_v14  ;;  %v2821_v26 = vcombine.low %v1983_v63, %v1997_v3  ;;  %v2005_v6 = vor.u32 %v2004_v34, %v2001_v59  ;;  %v2019_v7 = vor.u32 %v2018_v2, %v2015_v55  ;;  %v3345_v2 = vld [vmem:[%s4105_s3 + $0x230] sm:$0xff]  }
  0x7a   : > { %3177 = vmatprep.subr.bf16.mxu0 %v3332_v28  ;;  %3147 = vmatprep.mubr.bf16.mxu0 %v2731_v58  ;;  %v1968_v58 = vld [vmem:[#allocation2 + $0x48] sm:$0xf]  ;;  %v2052_v31 = vrot.slane %v2050_v5, 5  ;;  %v2061_v63 = vor.u32 %v2060_v23, %v2057_v40  ;;  %v2266_v5 = vrot.slane %v3862_v41, 5  ;;  %v2270_v40 = vrot.slane %v3874_v17, 5 }
  0x7b   : > { %3215 = vmatprep.mubr.bf16.mxu1 %v2821_v26  ;;  %v2006_v22 = vrot.slane %v2005_v6, 4  ;;  %v2020_v43 = vrot.slane %v2019_v7, 4  ;;  %v2069_v35 = vshrl.u32 %v1968_v58, 16  ;;  %v2072_v61 = vshll.u32 %v1968_v58, 16  ;;  %v3344_v26 = vld [vmem:[%s4105_s3 + $0x180] sm:$0xff]   ;;  %v3352_v58 = vld [vmem:[%s4105_s3 + $0x218] sm:$0xff]  }
  0x7c   : > { %3206 = vmatpush3.bf16.msra.mxu1 %v3333_v14  ;;  %v1962_v14 = vld [vmem:[#allocation2 + $0x30] sm:$0xf]  ;;  %v2062_v7 = vrot.slane %v2061_v63, 4  ;;  %v3351_v41 = vld [vmem:[#allocation2 + $0x40] ss:$8 sps:$4 sm:$0xff]   ;;  %v2836_v23 = vrot.slane %v2239_v11, 9 }
  0x7d   : > { %3178 = vmatpush3.bf16.msra.mxu0 %v3332_v28  ;;  %3207 = vmatprep.subr.bf16.mxu1 %v3335_v49  ;;  %v2027_v16 = vshrl.u32 %v1962_v14, 16  ;;  %v2030_v38 = vshll.u32 %v1962_v14, 16  ;;  %v2011_v15 = vsel %vm3542_vm8, %v2006_v22, %v2010_v18  ;;  %v2025_v51 = vsel %vm3542_vm8, %v2020_v43, %v2024_v20  ;;  %v3917_v28 = vld [vmem:[#allocation2 + $0x44] sm:$0x1]  ;;  %v3348_v14 = vld [vmem:[%s4105_s3 + $0x228] sm:$0xff]  }
  0x7e   : > { %3179 = vmatprep.subr.bf16.mxu0 %v3334_v0  ;;  %v2064_v57 = vshll.u32 %v3917_v28, 16  ;;  %v2822_v54 = vcombine.low %v2011_v15, %v2025_v51  ;;  %v2071_v34 = vrot.slane %v2069_v35, 4  ;;  %v2278_v18 = vrot.slane %v3907_v12, 5 }
  0x7f   : > { %v2029_v30 = vrot.slane %v2027_v16, 4  ;;  %v2032_v46 = vrot.slane %v2030_v38, 5  ;;  %v3347_v16 = vld [vmem:[#allocation2 + $0x20] ss:$8 sps:$4 sm:$0xff]   ;;  %v2262_v51 = vrot.slane %v3860_v36, 5  ;;  %v2286_v50 = vrot.slane %v3917_v28, 5 }
  0x80   : > { %3148 = vmatmul.mubr.bf16.gmra.mxu0 %v2732_v37  ;;  %3208 = vmatpush3.bf16.msra.mxu1 %v3335_v49  ;;  %v2038_v49 = vrot.slane %v2036_v39, 5  ;;  %v2074_v37 = vrot.slane %v2072_v61, 5  ;;  %v2066_v55 = vrot.slane %v2064_v57, 5  ;;  %v2237_v39 = vld [vmem:[#allocation2 + $0x18] sm:$0xe]  ;;  %v3355_v57 = vld [vmem:[%s4105_s3 + $0x200] sm:$0xff]  }
  0x81   : > { %3180 = vmatpush3.bf16.msra.mxu0 %v3334_v0  ;;  %3209 = vmatprep.subr.bf16.mxu1 %v3337_v21  ;;  %v2033_v56 = vor.u32 %v2032_v46, %v2029_v30  ;;  %v2047_v0 = vor.u32 %v2046_v1, %v2043_v33  ;;  %v2834_v45 = vrot.slane %v2237_v39, 9  ;;  %v2263_v30 = vsel %vm3665_vm11, %v2833_v44, %v2262_v51  ;;  %v3353_v46 = vld [vmem:[%s4105_s3 + $0x210] sm:$0xff]   ;;  %v3354_v33 = vld [vmem:[%s4105_s3 + $0x208] sm:$0xff]   ;;  %v2242_v1 = vld [vmem:[#allocation2 + $0x40] sm:$0xe] }
  0x82   : > { %3181 = vmatprep.subr.bf16.mxu0 %v3336_v4  ;;  %3191 = vmatprep.mubr.bf16.mxu0 %v3346_v8  ;;  %v2075_v47 = vor.u32 %v2074_v37, %v2071_v34  ;;  %v2241_v8 = vld [vmem:[#allocation2 + $0x38] sm:$0xe]  ;;  %v2067_v20 = vsel %vm3542_vm8, %v2062_v7, %v2066_v55  ;;  %v2238_v28 = vld [vmem:[#allocation2 + $0x20] sm:$0xe] }
  0x83   : > { %v2034_v59 = vrot.slane %v2033_v56, 4  ;;  %v2838_v43 = vrot.slane %v2241_v8, 9  ;;  %v2267_v36 = vsel %vm3665_vm11, %v2834_v45, %v2266_v5 }
  0x84   : > { %3210 = vmatpush3.bf16.msra.mxu1 %v3337_v21  ;;  %v2048_v21 = vrot.slane %v2047_v0, 4  ;;  %v2835_v0 = vrot.slane %v2238_v28, 9 }
  0x85   : > { %3182 = vmatpush3.bf16.msra.mxu0 %v3336_v4  ;;  %3211 = vmatprep.subr.bf16.mxu1 %v3339_v13  ;;  %v2039_v3 = vsel %vm3542_vm8, %v2034_v59, %v2038_v49  ;;  %v2240_v4 = vld [vmem:[#allocation2 + $0x30] sm:$0xe]  ;;  %v2857_v49 = vcombine.low %v2263_v30, %v2267_v36  ;;  %v2275_v59 = vsel %vm3665_vm11, %v2836_v23, %v2274_v19 }
  0x86   : > { %3183 = vmatprep.subr.bf16.mxu0 %v3338_v9  ;;  %v2053_v6 = vsel %vm3542_vm8, %v2048_v21, %v2052_v31  ;;  %v2837_v22 = vrot.slane %v2240_v4, 9  ;;  %v2243_v31 = vld [vmem:[#allocation2 + $0x48] sm:$0xe] }
  0x87   : > { %v2840_v56 = vrot.slane %v2243_v31, 9 }
  0x88   : > { %3212 = vmatpush3.bf16.msra.mxu1 %v3339_v13  ;;  %v2076_v13 = vrot.slane %v2075_v47, 4  ;;  %v2279_v38 = vsel %vm3665_vm11, %v2837_v22, %v2278_v18 }
  0x89   : > { %3184 = vmatpush3.bf16.msra.mxu0 %v3338_v9  ;;  %3213 = vmatprep.subr.bf16.mxu1 %v3341_v27  ;;  %v2823_v9 = vcombine.low %v2039_v3, %v2053_v6  ;;  %v2291_v61 = vsel %vm3665_vm11, %v2840_v56, %v2290_v52 }
  0x8a   : > { %3185 = vmatprep.subr.bf16.mxu0 %v3340_v25 }
  0x8c   : > { %3214 = vmatpush3.bf16.msra.mxu1 %v3341_v27  ;;  %v2282_v27 = vrot.slane %v3909_v29, 5 }
  0x8d   : > { %3186 = vmatpush3.bf16.msra.mxu0 %v3340_v25  ;;  %3247 = vmatprep.subr.bf16.mxu1 %v3924_v48  ;;  %v2081_v25 = vsel %vm3542_vm8, %v2076_v13, %v2080_v53 }
  0x8e   : > { %3187 = vmatprep.subr.bf16.mxu0 %v3342_v62  ;;  %v2824_v12 = vcombine.low %v2067_v20, %v2081_v25  ;;  %v2283_v29 = vsel %vm3665_vm11, %v2838_v43, %v2282_v27 }
  0x8f   : > { %3216 = vmatmul.mubr.bf16.vlgmr.msra.gmra.mxu1 %v2822_v54  ;;  %v2859_v15 = vcombine.low %v2279_v38, %v2283_v29  ;;  %v2271_v54 = vsel %vm3665_vm11, %v2835_v0, %v2270_v40 }
  0x90   : > { %3255 = vmatpush3.bf16.msra.mxu1 %v3924_v48  ;;  %3219 = vmatprep.mubr.bf16.mxu1 %v2823_v9  ;;  %v2858_v34 = vcombine.low %v2271_v54, %v2275_v59 }
  0x91   : > { %3188 = vmatpush3.bf16.msra.mxu0 %v3342_v62  ;;  %3248 = vmatprep.subr.bf16.mxu1 %v3345_v2 }
  0x92   : > { %3189 = vmatprep.subr.bf16.mxu0 %v3344_v26 }
  0x94   : > { %3256 = vmatpush3.bf16.msra.mxu1 %v3345_v2 }
  0x95   : > { %3190 = vmatpush3.bf16.msra.mxu0 %v3344_v26  ;;  %3249 = vmatprep.subr.bf16.mxu1 %v3348_v14 }
  0x96   : > { %3223 = vmatprep.subr.bf16.mxu0 %v3924_v48 }
  0x97   : > { %3220 = vmatmul.mubr.bf16.gmra.mxu1 %v2824_v12 }
  0x98   : > { %3192 = vmatmul.mubr.bf16.vlgmr.msra.gmra.mxu0 %v3347_v16  ;;  %3257 = vmatpush3.bf16.msra.mxu1 %v3348_v14 }
  0x99   : > { %3224 = vmatpush3.bf16.msra.mxu0 %v3924_v48  ;;  %3250 = vmatprep.subr.bf16.mxu1 %v3349_v24  ;;  %v2839_v48 = vrot.slane %v2242_v1, 9 }
  0x9a   : > { %3225 = vmatprep.subr.bf16.mxu0 %v3345_v2  ;;  %3195 = vmatprep.mubr.bf16.mxu0 %v3350_v42 }
  0x9b   : > { %3243 = vmatprep.mubr.bf16.mxu1 %v2859_v15  ;;  %v2287_v35 = vsel %vm3665_vm11, %v2839_v48, %v2286_v50 }
  0x9c   : > { %3258 = vmatpush3.bf16.msra.mxu1 %v3349_v24  ;;  %v2860_v62 = vcombine.low %v2287_v35, %v2291_v61 }
  0x9d   : > { %3226 = vmatpush3.bf16.msra.mxu0 %v3345_v2  ;;  %3251 = vmatprep.subr.bf16.mxu1 %v3352_v58 }
  0x9e   : > { %3227 = vmatprep.subr.bf16.mxu0 %v3348_v14 }
  0xa0   : > { %3196 = vmatmul.mubr.bf16.gmra.mxu0 %v3351_v41  ;;  %3259 = vmatpush3.bf16.msra.mxu1 %v3352_v58 }
  0xa1   : > { %3228 = vmatpush3.bf16.msra.mxu0 %v3348_v14  ;;  %3252 = vmatprep.subr.bf16.mxu1 %v3353_v46 }
  0xa2   : > { %3229 = vmatprep.subr.bf16.mxu0 %v3349_v24  ;;  %3239 = vmatprep.mubr.bf16.mxu0 %v2857_v49 }
  0xa4   : > { %3260 = vmatpush3.bf16.msra.mxu1 %v3353_v46 }
  0xa5   : > { %3230 = vmatpush3.bf16.msra.mxu0 %v3349_v24  ;;  %3253 = vmatprep.subr.bf16.mxu1 %v3354_v33 }
  0xa6   : > { %3231 = vmatprep.subr.bf16.mxu0 %v3352_v58 }
  0xa8   : > { %3261 = vmatpush3.bf16.msra.mxu1 %v3354_v33 }
  0xa9   : > { %3232 = vmatpush3.bf16.msra.mxu0 %v3352_v58  ;;  %3254 = vmatprep.subr.bf16.mxu1 %v3355_v57 }
  0xaa   : > { %3233 = vmatprep.subr.bf16.mxu0 %v3353_v46 }
  0xac   : > { %3262 = vmatpush3.bf16.msra.mxu1 %v3355_v57 }
  0xad   : > { %3234 = vmatpush3.bf16.msra.mxu0 %v3353_v46 }
  0xae   : > { %3235 = vmatprep.subr.bf16.mxu0 %v3354_v33 }
  0xaf   : > { %3244 = vmatmul.mubr.bf16.vlgmr.msra.gmra.mxu1 %v2860_v62 }
  0xb1   : > { %3236 = vmatpush3.bf16.msra.mxu0 %v3354_v33 }
  0xb2   : > { %3237 = vmatprep.subr.bf16.mxu0 %v3355_v57 }
  0xb5   : > { %3238 = vmatpush3.bf16.msra.mxu0 %v3355_v57 }
  0xb8   : > { %3240 = vmatmul.mubr.bf16.vlgmr.msra.gmra.mxu0 %v2858_v34 }
  0xef   : > { %v3991_v37 = vpop.f32.mrf.mxu1 }
  0xf1   : > { %v3993_v21 = vpop.f32.mrf.mxu1 }
  0xf3   : > { %v3995_v17 = vpop.f32.mrf.mxu1 }
  0xf5   : > { %v3999_v63 = vpop.f32.mrf.mxu1 }
  0xf8   : > { %v3997_v60 = vpop.f32.mrf.mxu0 }
  0xfa   : > { %v4001_v55 = vpop.f32.mrf.mxu0 }
  0xfc   : > { %v4003_v3 = vpop.f32.mrf.mxu0 }
  0xfe   : > { %v4005_v47 = vpop.f32.mrf.mxu0 }
 0x107   : > { %v3077_v2 = vpop.f32.mrf.mxu1 }
 0x109   : > { %v893_v10 = vpop.f32.mrf.mxu1 }
 0x10b   : > { %v3078_v53 = vpop.f32.mrf.mxu1 }
 0x10d   : > { %v896_v6 = vpop.f32.mrf.mxu1 }
 0x10f   : > { %v3053_v4 = vpop.f32.mrf.mxu0  ;;  %v4007_v7 = vpop.f32.mrf.mxu1 }
 0x110   : > { %v902_v62 = vadd.f32 %v3077_v2, %v3053_v4  ;;  %v886_v2 = vadd.f32 %v3991_v37, %v3997_v60 }
 0x111   : > { %v756_v26 = vpop.f32.mrf.mxu0  ;;  %v4009_v9 = vpop.f32.mrf.mxu1 }
 0x112   : > { %v894_v19 = vadd.f32 %v893_v10, %v756_v26  ;;  %v889_v10 = vadd.f32 %v3995_v17, %v4003_v3 }
 0x113   : > { %v3054_v8 = vpop.f32.mrf.mxu0  ;;  %v4013_v20 = vpop.f32.mrf.mxu1 }
 0x114   : > { %v905_v0 = vadd.f32 %v3078_v53, %v3054_v8  ;;  %v878_v53 = vadd.f32 %v3993_v21, %v4001_v55 }
 0x115   : > { %v759_v13 = vpop.f32.mrf.mxu0  ;;  %v4017_v43 = vpop.f32.mrf.mxu1 }
 0x116   : > { %v897_v54 = vadd.f32 %v896_v6, %v759_v13  ;;  %v881_v13 = vadd.f32 %v3999_v63, %v4005_v47 }
 0x117   : > { %v3125_v14 = vpop.f32.mrf.mxu1 }
 0x118   : > { %v4011_v18 = vpop.f32.mrf.mxu0 }
 0x119   : > { %v1268_v12 = vpop.f32.mrf.mxu1 }
 0x11a   : > { %v4015_v22 = vpop.f32.mrf.mxu0 }
 0x11b   : > { %v3126_v16 = vpop.f32.mrf.mxu1 }
 0x11c   : > { %v3098_v27 = vpop.f32.mrf.mxu0 }
 0x11d   : > { %v1271_v29 = vpop.f32.mrf.mxu1 }
 0x11e   : > { %v4019_v25 = vpop.f32.mrf.mxu0 }
 0x11f   : > { %v1114_v60 = vadd.f32 %v4019_v25, %v881_v13 }
 0x120   : > { %v3101_v32 = vpop.f32.mrf.mxu0 }
 0x121   : > { %v1119_v59 = vadd.f32 %v3101_v32, %v902_v62  ;;  %v1116_v32 = vadd.f32 %v3098_v27, %v889_v10  ;;  %v1284_v27 = vadd.f32 %v4017_v43, %v1114_v60 }
 0x122   : > { %v1098_v38 = vpop.f32.mrf.mxu0 }
 0x123   : > { %v1286_v63 = vadd.f32 %v4013_v20, %v1116_v32 }
 0x124   : > { %v3102_v24 = vpop.f32.mrf.mxu0 }
 0x125   : > { %v1120_v34 = vadd.f32 %v3102_v24, %v905_v0 }
 0x126   : > { %v1101_v44 = vpop.f32.mrf.mxu0 }
 0x12f   : > { %v4021_v39 = vpop.f32.mrf.mxu1 }
 0x131   : > { %v4023_v42 = vpop.f32.mrf.mxu1 }
 0x132   : > { %4117 = vst [vmem:[#allocation3_spill] sm:$0xff] %v4023_v42 }
 0x133   : > { %v4027_v51 = vpop.f32.mrf.mxu1 }
 0x134   : > { %4118 = vst [vmem:[#allocation4_spill] sm:$0xff] %v4027_v51 }
 0x135   : > { %v4031_v5 = vpop.f32.mrf.mxu1 }
 0x136   : > { %4119 = vst [vmem:[#allocation5_spill] sm:$0xff] %v4031_v5  ;;  %v1289_v5 = vadd.f32 %v3125_v14, %v1119_v59  ;;  %v1115_v14 = vadd.f32 %v4011_v18, %v886_v2 }
 0x137   : > { %v3173_v30 = vpop.f32.mrf.mxu1 }
 0x138   : > { %v4025_v15 = vpop.f32.mrf.mxu0  ;;  %v1285_v24 = vadd.f32 %v4007_v7, %v1115_v14 }
 0x139   : > { %v1760_v41 = vpop.f32.mrf.mxu1  ;;  %v4127_v43 = vld [vmem:[#allocation3_spill] sm:$0xff] }
 0x13a   : > { %v4029_v45 = vpop.f32.mrf.mxu0  ;;  %v1567_v25 = vadd.f32 %v4025_v15, %v1285_v24 }
 0x13b   : > { %v3174_v49 = vpop.f32.mrf.mxu1 }
 0x13c   : > { %v4033_v58 = vpop.f32.mrf.mxu0 }
 0x13d   : > { %v1763_v1 = vpop.f32.mrf.mxu1 }
 0x13e   : > { %v4035_v36 = vpop.f32.mrf.mxu0 }
 0x13f   : > { %v1566_v7 = vadd.f32 %v4035_v36, %v1284_v27 }
 0x140   : > { %v3149_v46 = vpop.f32.mrf.mxu0 }
 0x141   : > { %v1571_v42 = vadd.f32 %v3149_v46, %v1289_v5 }
 0x142   : > { %v1550_v33 = vpop.f32.mrf.mxu0 }
 0x144   : > { %v3150_v50 = vpop.f32.mrf.mxu0 }
 0x146   : > { %v1553_v48 = vpop.f32.mrf.mxu0 }
 0x14f   : > { %v4037_v31 = vpop.f32.mrf.mxu1 }
 0x150   : > { %4120 = vst [vmem:[#allocation6_spill] sm:$0xff] %v4037_v31  ;;  %v1118_v31 = vadd.f32 %v1101_v44, %v897_v54 }
 0x151   : > { %v4039_v52 = vpop.f32.mrf.mxu1 }
 0x152   : > { %4121 = vst [vmem:[#allocation7_spill] sm:$0xff] %v4039_v52  ;;  %v1117_v52 = vadd.f32 %v1098_v38, %v894_v19 }
 0x153   : > { %v4043_v57 = vpop.f32.mrf.mxu1 }
 0x154   : > { %4123 = vst [vmem:[#allocation9_spill] sm:$0xff] %v4043_v57  ;;  %v1287_v51 = vadd.f32 %v1268_v12, %v1117_v52  ;;  %v1113_v12 = vadd.f32 %v4015_v22, %v878_v53 }
 0x155   : > { %v4049_v28 = vpop.f32.mrf.mxu1 }
 0x156   : > { %4126 = vst [vmem:[#allocation12_spill] sm:$0xff] %v4049_v28  ;;  %v1569_v6 = vadd.f32 %v1550_v33, %v1287_v51  ;;  %v1283_v44 = vadd.f32 %v4009_v9, %v1113_v12  ;;  %v1568_v51 = vadd.f32 %v4033_v58, %v1286_v63 }
 0x157   : > { %v3221_v23 = vpop.f32.mrf.mxu1  ;;  %v4133_v54 = vld [vmem:[#allocation6_spill] sm:$0xff] }
 0x158   : > { %v4041_v56 = vpop.f32.mrf.mxu0  ;;  %v1779_v38 = vadd.f32 %v1760_v41, %v1569_v6 }
 0x159   : > { %4122 = vst [vmem:[#allocation8_spill] sm:$0xff] %v4041_v56  ;;  %v2213_v57 = vpop.f32.mrf.mxu1 }
 0x15a   : > { %v4045_v35 = vpop.f32.mrf.mxu0 }
 0x15b   : > { %4124 = vst [vmem:[#allocation10_spill] sm:$0xff] %v4045_v35  ;;  %v1290_v35 = vadd.f32 %v3126_v16, %v1120_v34  ;;  %v3222_v26 = vpop.f32.mrf.mxu1  ;;  %v1781_v16 = vadd.f32 %v3173_v30, %v1571_v42  ;;  %v1565_v42 = vadd.f32 %v4029_v45, %v1283_v44  ;;  %v4134_v34 = vld [vmem:[#allocation7_spill] sm:$0xff]  ;;  %v4135_v53 = vld [vmem:[#allocation9_spill] sm:$0xff] }
 0x15c   : > { %v4047_v61 = vpop.f32.mrf.mxu0 }
 0x15d   : > { %4125 = vst [vmem:[#allocation11_spill] sm:$0xff] %v4047_v61  ;;  %v1288_v61 = vadd.f32 %v1271_v29, %v1118_v31  ;;  %v1572_v28 = vadd.f32 %v3150_v50, %v1290_v35  ;;  %v2216_v55 = vpop.f32.mrf.mxu1  ;;  %v1775_v31 = vadd.f32 %v4127_v43, %v1565_v42  ;;  %v4128_v50 = vld [vmem:[#allocation4_spill] sm:$0xff] }
 0x15e   : > { %v4051_v11 = vpop.f32.mrf.mxu0  ;;  %v1778_v15 = vadd.f32 %v4128_v50, %v1568_v51 }
 0x15f   : > { %v1570_v8 = vadd.f32 %v1553_v48, %v1288_v61  ;;  %v1782_v37 = vadd.f32 %v3174_v49, %v1572_v28  ;;  %v4129_v48 = vld [vmem:[#allocation5_spill] sm:$0xff] }
 0x160   : > { %v3197_v40 = vpop.f32.mrf.mxu0 }
 0x161   : > { %v1780_v17 = vadd.f32 %v1763_v1, %v1570_v8  ;;  %v1952_v3 = vadd.f32 %v3197_v40, %v1781_v16  ;;  %v1777_v1 = vadd.f32 %v4021_v39, %v1567_v25 }
 0x162   : > { %v1931_v56 = vpop.f32.mrf.mxu0  ;;  %v4131_v35 = vld [vmem:[#allocation10_spill] sm:$0xff] }
 0x163   : > { %v1950_v18 = vadd.f32 %v1931_v56, %v1779_v38  ;;  %v2234_v30 = vadd.f32 %v3221_v23, %v1952_v3  ;;  %v1776_v56 = vadd.f32 %v4129_v48, %v1566_v7  ;;  %v1946_v61 = vadd.f32 %v4131_v35, %v1775_v31 }
 0x164   : > { %v3198_v4 = vpop.f32.mrf.mxu0  ;;  %v4132_v28 = vld [vmem:[#allocation11_spill] sm:$0xff] }
 0x165   : > { %v1953_v29 = vadd.f32 %v3198_v4, %v1782_v37  ;;  %v2232_v46 = vadd.f32 %v2213_v57, %v1950_v18  ;;  %v4130_v57 = vld [vmem:[#allocation8_spill] sm:$0xff]  ;;  %v1949_v62 = vadd.f32 %v4132_v28, %v1778_v15  ;;  %v1947_v23 = vadd.f32 %v4051_v11, %v1776_v56 }
 0x166   : > { %v1934_v21 = vpop.f32.mrf.mxu0  ;;  %v1948_v39 = vadd.f32 %v4130_v57, %v1777_v1  ;;  %v2228_v2 = vadd.f32 %v4134_v34, %v1946_v61  ;;  %v2496_v1 = vlaneseq }
 0x167   : > { %v1951_v22 = vadd.f32 %v1934_v21, %v1780_v17  ;;  %v2235_v41 = vadd.f32 %v3222_v26, %v1953_v29  ;;  %v2231_v10 = vadd.f32 %v4135_v53, %v1949_v62  ;;  %v4136_v26 = vld [vmem:[#allocation12_spill] sm:$0xff] }
 0x168   : > { %v2230_v59 = vadd.f32 %v4133_v54, %v1948_v39  ;;  %v2229_v6 = vadd.f32 %v4136_v26, %v1947_v23 }
 0x169   : > { %v2233_v20 = vadd.f32 %v2216_v55, %v1951_v22 }
 0x16f   : > { %v3245_v47 = vpop.f32.mrf.mxu1 }
 0x170   : > { %v2444_v49 = vadd.f32 %v3245_v47, %v2234_v30 }
 0x171   : > { %v2423_v5 = vpop.f32.mrf.mxu1 }
 0x172   : > { %v2442_v58 = vadd.f32 %v2423_v5, %v2232_v46  ;;  %v2481_v25 = vmul.f32 %v2444_v49, %v2444_v49 }
 0x173   : > { %v3246_v9 = vpop.f32.mrf.mxu1 }
 0x174   : > { %v2445_v33 = vadd.f32 %v3246_v9, %v2235_v41  ;;  %v2479_v44 = vmul.f32 %v2442_v58, %v2442_v58 }
 0x175   : > { %v2426_v45 = vpop.f32.mrf.mxu1 }
 0x176   : > { %v2915_v36 = vpack.c.bf16 %v2445_v33, %v2444_v49  ;;  %v2443_v52 = vadd.f32 %v2426_v45, %v2233_v20  ;;  %v2482_v5 = vmul.f32 %v2445_v33, %v2445_v33  ;;  %v2497_v45 = vshrl.u32 %v2496_v1, 7 }
 0x178   : > { %2922 = vst [vmem:[%s4080_s17 + $0x18] sm:$0xff] %v2915_v36   ;;  %v2910_v0 = vpack.c.bf16 %v2443_v52, %v2442_v58  ;;  %v3241_v40 = vpop.f32.mrf.mxu0  ;;  %v2480_v18 = vmul.f32 %v2443_v52, %v2443_v52  ;;  %vm2499_vm12 = vcmp.eq.s32.totalorder %v2497_v45, 1  ;;  %vm2498_vm13 = vcmp.eq.s32.totalorder %v2497_v45, 0 }
 0x179   : > { %v2440_v8 = vadd.f32 %v3241_v40, %v2230_v59 }
 0x17a   : > { %2921 = vst [vmem:[%s4080_s17 + $0x10] sm:$0xff] %v2910_v0   ;;  %v2407_v19 = vpop.f32.mrf.mxu0 }
 0x17b   : > { %v2438_v13 = vadd.f32 %v2407_v19, %v2228_v2  ;;  %v2477_v55 = vmul.f32 %v2440_v8, %v2440_v8 }
 0x17c   : > { %v3242_v4 = vpop.f32.mrf.mxu0 }
 0x17d   : > { %v2441_v14 = vadd.f32 %v3242_v4, %v2231_v10  ;;  %v2475_v37 = vmul.f32 %v2438_v13, %v2438_v13 }
 0x17e   : > { %v2410_v12 = vpop.f32.mrf.mxu0 }
 0x17f   : > { %v2905_v32 = vpack.c.bf16 %v2441_v14, %v2440_v8  ;;  %v2439_v16 = vadd.f32 %v2410_v12, %v2229_v6  ;;  %v2478_v3 = vmul.f32 %v2441_v14, %v2441_v14 }
 0x181   : > { %2920 = vst [vmem:[%s4080_s17 + $0x8] sm:$0xff] %v2905_v32   ;;  %v2900_v11 = vpack.c.bf16 %v2439_v16, %v2438_v13  ;;  %v2462_v60 = vadd.f32 %v2439_v16, %v2438_v13  ;;  %v2476_v21 = vmul.f32 %v2439_v16, %v2439_v16 }
 0x183   : > { %2901 = vst [vmem:[%s4080_s17] sm:$0xff] %v2900_v11   ;;  %v2463_v38 = vadd.f32 %v2462_v60, %v2440_v8  ;;  %v2483_v17 = vadd.f32 %v2476_v21, %v2475_v37 }
 0x185   : > { %v2464_v29 = vadd.f32 %v2463_v38, %v2441_v14  ;;  %v2484_v24 = vadd.f32 %v2483_v17, %v2477_v55 }
 0x187   : > { %v2465_v63 = vadd.f32 %v2464_v29, %v2442_v58  ;;  %v2485_v47 = vadd.f32 %v2484_v24, %v2478_v3 }
 0x189   : > { %v2466_v22 = vadd.f32 %v2465_v63, %v2443_v52  ;;  %v2486_v27 = vadd.f32 %v2485_v47, %v2479_v44 }
 0x18b   : > { %v2467_v42 = vadd.f32 %v2466_v22, %v2444_v49  ;;  %v2487_v51 = vadd.f32 %v2486_v27, %v2480_v18 }
 0x18d   : > { %v2468_v30 = vadd.f32 %v2467_v42, %v2445_v33  ;;  %v2488_v41 = vadd.f32 %v2487_v51, %v2481_v25 }
 0x18f   : > { %v2469_v7 = vrot.slane %v2468_v30, 4  ;;  %v2489_v9 = vadd.f32 %v2488_v41, %v2482_v5 }
 0x191   : > { %v2470_v46 = vadd.f32 %v2469_v7, %v2468_v30  ;;  %v2490_v20 = vrot.slane %v2489_v9, 4 }
 0x193   : > { %v2471_v43 = vrot.slane %v2470_v46, 2  ;;  %v2491_v31 = vadd.f32 %v2490_v20, %v2489_v9 }
 0x195   : > { %v2472_v50 = vadd.f32 %v2471_v43, %v2470_v46  ;;  %v2492_v15 = vrot.slane %v2491_v31, 2 }
 0x197   : > { %v2493_v58 = vadd.f32 %v2492_v15, %v2491_v31  ;;  %v2473_v36 = vrot.slane %v2472_v50, 1 }
 0x199   : > { %v2494_v52 = vrot.slane %v2493_v58, 1  ;;  %v2474_v33 = vadd.f32 %v2473_v36, %v2472_v50 }
 0x19b   : > { %v2495_v49 = vadd.f32 %v2494_v52, %v2493_v58 }
 0x19d   : > { %v2500_v48 = vsel %vm2499_vm12, %v2495_v49, 0.0 }
 0x19e   : > { %v2501_v56 = vsel %vm2498_vm13, %v2474_v33, %v2500_v48 }
 0x19f   : > { %2502 = vst [vmem:[%s235_s23] sm:$0xff] %v2501_v56 }
 0x1a0 PF: > { %s16_s18 = sadd.s32 1, %s3362_s18  }
 0x1a1   : > { %p13_p4 = scmp.ge.s32.totalorder %s16_s18, 4  }
 0x1a3   :  { %15 = sbr.rel (!%p13_p4) target bundleno = 1 (0x1), region = 88 }

</bundles_post_ra>
